<compile_context>
chip_gen: v6e
topology: v6e:2x2x1
jax: 0.10.0
libtpu: 0.0.40
codegen_flags: <defaults>
</compile_context>

<pallas_src>
import math
from functools import partial

import jax
import jax.numpy as jnp
from jax.experimental import pallas as pl
from jax.experimental.pallas import tpu as pltpu


# ---------------------------------------------------------------------------
# Fused kernel: QKV projection + per-head "attention" (literal torch einsum
# semantics) + head-mixing reshape + fc_out, all in one grid step.
# ---------------------------------------------------------------------------
def _qvit_self_attention_kernel(x_ref, wqkv_ref, bqkv_ref, wout_ref, bout_ref,
                                o_ref, *, B, N, H, D):
    E = H * D
    inv_scale = 1.0 / math.sqrt(D)

    # ---- (1) QKV projection: one lane-dense MXU matmul, bf16 ops / f32 acc.
    x_bf = x_ref[...].astype(jnp.bfloat16)                     # (B*N, E)
    qkv = jnp.dot(x_bf, wqkv_ref[...],
                  preferred_element_type=jnp.float32)
    qkv = qkv + bqkv_ref[...]                                  # (B*N, 3E) f32

    w_out = wout_ref[...]                                      # (E, E) bf16
    bias_out = bout_ref[...]                                   # (1, E) f32

    for b in range(B):
        rows = qkv[b * N:(b + 1) * N, :]                       # (N, 3E)
        q_b = rows[:, 0:E]                                     # (N, E)
        k_b = rows[:, E:2 * E]
        v_b = rows[:, 2 * E:3 * E]

        # Token-sum of V for every head at once: lane h*D+d holds u[b,h,d].
        u_all = jnp.sum(v_b, axis=0, keepdims=True)            # (1, E) f32

        # ---- (2) Per-head softmax row-sums s[b,h,i] (columns, numerically ~1).
        # The module's einsum 'bnqk,bnvd->bnqd' only uses attention through
        # its row sums, so that is all we need to keep.
        s_cols = []
        for h in range(H):
            q_h = q_b[:, h * D:(h + 1) * D]                    # (N, D)
            k_h = k_b[:, h * D:(h + 1) * D]                    # (N, D)
            energy = jax.lax.dot_general(                      # q @ k^T
                q_h, k_h, (((1,), (1,)), ((), ())),
                preferred_element_type=jnp.float32) * inv_scale  # (N, N)
            m = jnp.max(energy, axis=-1, keepdims=True)
            p = jnp.exp(energy - m)
            attn = p / jnp.sum(p, axis=-1, keepdims=True)
            s_cols.append(jnp.sum(attn, axis=-1, keepdims=True))  # (N, 1)

        # ---- (3)+(4) Head-mixing reshape fused with fc_out.
        # mixed[p, j*D + d] = s[b, hq, iq] * u[b, hq, d],
        #   with (hq, iq) = divmod(p*H + j, N)   (exact torch reshape index),
        # and fc_out distributes over the D-wide lane groups j:
        #   out[p, :] = sum_j mixed[p, j*D:(j+1)*D] @ w_out[j*D:(j+1)*D, :].
        acc = jnp.zeros((N, E), jnp.float32)
        for j in range(H):
            pieces = []
            for p in range(N):
                hq, iq = divmod(p * H + j, N)
                s_pj = s_cols[hq][iq:iq + 1, 0:1]              # (1, 1)
                u_pc = u_all[:, hq * D:(hq + 1) * D]           # (1, D)
                pieces.append(s_pj * u_pc)                     # (1, D)
            block_j = jnp.concatenate(pieces, axis=0)          # (N, D) f32
            acc = acc + jnp.dot(block_j.astype(jnp.bfloat16),
                                w_out[j * D:(j + 1) * D, :],
                                preferred_element_type=jnp.float32)

        o_ref[b * N:(b + 1) * N, :] = (acc + bias_out).astype(o_ref.dtype)


# ---------------------------------------------------------------------------
# Wrapper: one pallas_call, single grid step, whole arrays as VMEM blocks.
# ---------------------------------------------------------------------------
def self_attention(x, w_qkv, b_qkv, w_out, b_out, *, num_heads):
    B, N, E = x.shape
    assert E % num_heads == 0, "embed_dim must be divisible by num_heads"
    D = E // num_heads

    x2d = x.reshape(B * N, E)
    kernel = partial(_qvit_self_attention_kernel, B=B, N=N, H=num_heads, D=D)

    out2d = pl.pallas_call(
        kernel,
        out_shape=jax.ShapeDtypeStruct((B * N, E), x.dtype),
        grid=(1,),
        in_specs=[
            pl.BlockSpec((B * N, E), lambda i: (0, 0)),      # activations
            pl.BlockSpec((E, 3 * E), lambda i: (0, 0)),      # w_qkv (bf16)
            pl.BlockSpec((1, 3 * E), lambda i: (0, 0)),      # b_qkv
            pl.BlockSpec((E, E), lambda i: (0, 0)),          # w_out (bf16)
            pl.BlockSpec((1, E), lambda i: (0, 0)),          # b_out
        ],
        out_specs=pl.BlockSpec((B * N, E), lambda i: (0, 0)),
        compiler_params=pltpu.CompilerParams(
            dimension_semantics=("arbitrary",),   # single step, no TC split
            vmem_limit_bytes=8 * 1024 * 1024,     # right-sized (v7x-safe)
        ),
    )(x2d,
      w_qkv.astype(jnp.bfloat16), b_qkv.reshape(1, 3 * E),
      w_out.astype(jnp.bfloat16), b_out.reshape(1, E))

    return out2d.reshape(B, N, E)


# ---------------------------------------------------------------------------
# Pure-JAX f32 reference, literal translation of the PyTorch module
# (including its quirky einsum label 'v' and the head-mixing reshape).
# ---------------------------------------------------------------------------
def self_attention_ref(x, w_qkv, b_qkv, w_out, b_out, *, num_heads):
    B, N, E = x.shape
    D = E // num_heads
    qkv = x @ w_qkv + b_qkv                                # (B, N, 3E)
    qkv = qkv.reshape(B, N, 3, num_heads, D)
    qkv = jnp.transpose(qkv, (2, 0, 3, 1, 4))              # (3, B, H, N, D)
    q, k, v = qkv[0], qkv[1], qkv[2]
    energy = jnp.einsum("bnqd,bnkd->bnqk", q, k)
    attn = jax.nn.softmax(energy / math.sqrt(D), axis=-1)
    # Literal torch einsum: 'k' and 'v' are summed independently.
    out = jnp.einsum("bnqk,bnvd->bnqd", attn, v)           # (B, H, N, D)
    out = out.reshape(B, N, E)                             # head-mixing reshape
    return out @ w_out + b_out


if __name__ == "__main__":
    B, N, E, H = 2, 8, 32, 4

    key = jax.random.PRNGKey(0)
    kx, k1, k2, k3, k4 = jax.random.split(key, 5)
    x = jax.random.normal(kx, (B, N, E), dtype=jnp.float32)

    # Deterministic parameter init (uniform, like torch.nn.Linear default).
    lim = 1.0 / math.sqrt(E)
    w_qkv = jax.random.uniform(k1, (E, 3 * E), jnp.float32, -lim, lim)
    b_qkv = jax.random.uniform(k2, (3 * E,), jnp.float32, -lim, lim)
    w_out = jax.random.uniform(k3, (E, E), jnp.float32, -lim, lim)
    b_out = jax.random.uniform(k4, (E,), jnp.float32, -lim, lim)

    fwd = jax.jit(self_attention, static_argnames=("num_heads",))
    out = fwd(x, w_qkv, b_qkv, w_out, b_out, num_heads=H)
    out = jax.block_until_ready(out)

    ref = self_attention_ref(x, w_qkv, b_qkv, w_out, b_out, num_heads=H)
    assert out.shape == (B, N, E)
    # bf16 MXU operands (pre-cast weights) vs pure-f32 reference -> small drift.
    err = float(jnp.max(jnp.abs(out - ref)))
    assert jnp.allclose(out, ref, atol=7.5e-2, rtol=7.5e-2), err

    print("KERNEL_OK")
</pallas_src>

<mosaic_0001>
module attributes {stable_mosaic.version = 11 : i64} {
  func.func @_qvit_self_attention_kernel(%arg0: i32, %arg1: memref<16x32xf32, #tpu.memory_space<vmem>>, %arg2: memref<32x96xbf16, #tpu.memory_space<vmem>>, %arg3: memref<1x96xf32, #tpu.memory_space<vmem>>, %arg4: memref<32x32xbf16, #tpu.memory_space<vmem>>, %arg5: memref<1x32xf32, #tpu.memory_space<vmem>>, %arg6: memref<16x32xf32, #tpu.memory_space<vmem>>) attributes {dimension_semantics = [#tpu.dimension_semantics<arbitrary>], iteration_bounds = array<i64: 1>, scalar_prefetch = 0 : i64, scratch_operands = 0 : i64, tpu.core_type = #tpu.core_type<tc>, window_params = [{pipeline_mode = #tpu.pipeline_mode<synchronous>, transform_indices = @transform_0, window_bounds = array<i64: 16, 32>}, {pipeline_mode = #tpu.pipeline_mode<synchronous>, transform_indices = @transform_1, window_bounds = array<i64: 32, 96>}, {pipeline_mode = #tpu.pipeline_mode<synchronous>, transform_indices = @transform_2, window_bounds = array<i64: 1, 96>}, {pipeline_mode = #tpu.pipeline_mode<synchronous>, transform_indices = @transform_3, window_bounds = array<i64: 32, 32>}, {pipeline_mode = #tpu.pipeline_mode<synchronous>, transform_indices = @transform_4, window_bounds = array<i64: 1, 32>}, {pipeline_mode = #tpu.pipeline_mode<synchronous>, transform_indices = @transform_5, window_bounds = array<i64: 16, 32>}]} {
    %c0 = arith.constant 0 : index
    %c0_0 = arith.constant 0 : index
    %0 = vector.load %arg1[%c0, %c0_0] : memref<16x32xf32, #tpu.memory_space<vmem>>, vector<16x32xf32>
    %1 = arith.truncf %0 : vector<16x32xf32> to vector<16x32xbf16>
    %c0_1 = arith.constant 0 : index
    %c0_2 = arith.constant 0 : index
    %2 = vector.load %arg2[%c0_1, %c0_2] : memref<32x96xbf16, #tpu.memory_space<vmem>>, vector<32x96xbf16>
    %cst = arith.constant dense<0.000000e+00> : vector<16x96xf32>
    %3 = tpu.matmul %1, %2, %cst {dimension_numbers = #tpu.dot_dimension_numbers<[1], [0], [0], [1], [0, 0, 1, 1], [], []>} : vector<16x32xbf16>, vector<32x96xbf16>, vector<16x96xf32> -> vector<16x96xf32>
    %c0_3 = arith.constant 0 : index
    %c0_4 = arith.constant 0 : index
    %4 = vector.load %arg3[%c0_3, %c0_4] : memref<1x96xf32, #tpu.memory_space<vmem>>, vector<1x96xf32>
    %5 = vector.broadcast %4 : vector<1x96xf32> to vector<16x96xf32>
    %6 = arith.addf %3, %5 : vector<16x96xf32>
    %c0_5 = arith.constant 0 : index
    %c0_6 = arith.constant 0 : index
    %7 = vector.load %arg4[%c0_5, %c0_6] : memref<32x32xbf16, #tpu.memory_space<vmem>>, vector<32x32xbf16>
    %c0_7 = arith.constant 0 : index
    %c0_8 = arith.constant 0 : index
    %8 = vector.load %arg5[%c0_7, %c0_8] : memref<1x32xf32, #tpu.memory_space<vmem>>, vector<1x32xf32>
    %9 = vector.extract_strided_slice %6 {offsets = [0, 0], sizes = [8, 96], strides = [1, 1]} : vector<16x96xf32> to vector<8x96xf32>
    %10 = vector.extract_strided_slice %9 {offsets = [0, 0], sizes = [8, 32], strides = [1, 1]} : vector<8x96xf32> to vector<8x32xf32>
    %11 = vector.extract_strided_slice %9 {offsets = [0, 32], sizes = [8, 32], strides = [1, 1]} : vector<8x96xf32> to vector<8x32xf32>
    %12 = vector.extract_strided_slice %9 {offsets = [0, 64], sizes = [8, 32], strides = [1, 1]} : vector<8x96xf32> to vector<8x32xf32>
    %cst_9 = arith.constant dense<0.000000e+00> : vector<32xf32>
    %13 = vector.multi_reduction <add>, %12, %cst_9 [0] : vector<8x32xf32> to vector<32xf32>
    %14 = vector.shape_cast %13 : vector<32xf32> to vector<1x32xf32>
    %15 = vector.extract_strided_slice %10 {offsets = [0, 0], sizes = [8, 8], strides = [1, 1]} : vector<8x32xf32> to vector<8x8xf32>
    %16 = vector.extract_strided_slice %11 {offsets = [0, 0], sizes = [8, 8], strides = [1, 1]} : vector<8x32xf32> to vector<8x8xf32>
    %cst_10 = arith.constant dense<0.000000e+00> : vector<8x8xf32>
    %17 = tpu.matmul %15, %16, %cst_10 {dimension_numbers = #tpu.dot_dimension_numbers<[1], [1], [0], [0], [0, 0, 1, 0], [], []>} : vector<8x8xf32>, vector<8x8xf32>, vector<8x8xf32> -> vector<8x8xf32>
    %cst_11 = arith.constant 0.353553385 : f32
    %18 = vector.broadcast %cst_11 : f32 to vector<8x8xf32>
    %19 = arith.mulf %17, %18 : vector<8x8xf32>
    %cst_12 = arith.constant dense<0xFF800000> : vector<8xf32>
    %20 = vector.multi_reduction <maximumf>, %19, %cst_12 [1] : vector<8x8xf32> to vector<8xf32>
    %21 = vector.shape_cast %20 : vector<8xf32> to vector<8x1xf32>
    %22 = vector.broadcast %21 : vector<8x1xf32> to vector<8x8xf32>
    %23 = arith.subf %19, %22 : vector<8x8xf32>
    %24 = math.exp %23 : vector<8x8xf32>
    %cst_13 = arith.constant dense<0.000000e+00> : vector<8xf32>
    %25 = vector.multi_reduction <add>, %24, %cst_13 [1] : vector<8x8xf32> to vector<8xf32>
    %26 = vector.shape_cast %25 : vector<8xf32> to vector<8x1xf32>
    %27 = vector.broadcast %26 : vector<8x1xf32> to vector<8x8xf32>
    %28 = arith.divf %24, %27 : vector<8x8xf32>
    %cst_14 = arith.constant dense<0.000000e+00> : vector<8xf32>
    %29 = vector.multi_reduction <add>, %28, %cst_14 [1] : vector<8x8xf32> to vector<8xf32>
    %30 = vector.shape_cast %29 : vector<8xf32> to vector<8x1xf32>
    %31 = vector.extract_strided_slice %10 {offsets = [0, 8], sizes = [8, 8], strides = [1, 1]} : vector<8x32xf32> to vector<8x8xf32>
    %32 = vector.extract_strided_slice %11 {offsets = [0, 8], sizes = [8, 8], strides = [1, 1]} : vector<8x32xf32> to vector<8x8xf32>
    %cst_15 = arith.constant dense<0.000000e+00> : vector<8x8xf32>
    %33 = tpu.matmul %31, %32, %cst_15 {dimension_numbers = #tpu.dot_dimension_numbers<[1], [1], [0], [0], [0, 0, 1, 0], [], []>} : vector<8x8xf32>, vector<8x8xf32>, vector<8x8xf32> -> vector<8x8xf32>
    %cst_16 = arith.constant 0.353553385 : f32
    %34 = vector.broadcast %cst_16 : f32 to vector<8x8xf32>
    %35 = arith.mulf %33, %34 : vector<8x8xf32>
    %cst_17 = arith.constant dense<0xFF800000> : vector<8xf32>
    %36 = vector.multi_reduction <maximumf>, %35, %cst_17 [1] : vector<8x8xf32> to vector<8xf32>
    %37 = vector.shape_cast %36 : vector<8xf32> to vector<8x1xf32>
    %38 = vector.broadcast %37 : vector<8x1xf32> to vector<8x8xf32>
    %39 = arith.subf %35, %38 : vector<8x8xf32>
    %40 = math.exp %39 : vector<8x8xf32>
    %cst_18 = arith.constant dense<0.000000e+00> : vector<8xf32>
    %41 = vector.multi_reduction <add>, %40, %cst_18 [1] : vector<8x8xf32> to vector<8xf32>
    %42 = vector.shape_cast %41 : vector<8xf32> to vector<8x1xf32>
    %43 = vector.broadcast %42 : vector<8x1xf32> to vector<8x8xf32>
    %44 = arith.divf %40, %43 : vector<8x8xf32>
    %cst_19 = arith.constant dense<0.000000e+00> : vector<8xf32>
    %45 = vector.multi_reduction <add>, %44, %cst_19 [1] : vector<8x8xf32> to vector<8xf32>
    %46 = vector.shape_cast %45 : vector<8xf32> to vector<8x1xf32>
    %47 = vector.extract_strided_slice %10 {offsets = [0, 16], sizes = [8, 8], strides = [1, 1]} : vector<8x32xf32> to vector<8x8xf32>
    %48 = vector.extract_strided_slice %11 {offsets = [0, 16], sizes = [8, 8], strides = [1, 1]} : vector<8x32xf32> to vector<8x8xf32>
    %cst_20 = arith.constant dense<0.000000e+00> : vector<8x8xf32>
    %49 = tpu.matmul %47, %48, %cst_20 {dimension_numbers = #tpu.dot_dimension_numbers<[1], [1], [0], [0], [0, 0, 1, 0], [], []>} : vector<8x8xf32>, vector<8x8xf32>, vector<8x8xf32> -> vector<8x8xf32>
    %cst_21 = arith.constant 0.353553385 : f32
    %50 = vector.broadcast %cst_21 : f32 to vector<8x8xf32>
    %51 = arith.mulf %49, %50 : vector<8x8xf32>
    %cst_22 = arith.constant dense<0xFF800000> : vector<8xf32>
    %52 = vector.multi_reduction <maximumf>, %51, %cst_22 [1] : vector<8x8xf32> to vector<8xf32>
    %53 = vector.shape_cast %52 : vector<8xf32> to vector<8x1xf32>
    %54 = vector.broadcast %53 : vector<8x1xf32> to vector<8x8xf32>
    %55 = arith.subf %51, %54 : vector<8x8xf32>
    %56 = math.exp %55 : vector<8x8xf32>
    %cst_23 = arith.constant dense<0.000000e+00> : vector<8xf32>
    %57 = vector.multi_reduction <add>, %56, %cst_23 [1] : vector<8x8xf32> to vector<8xf32>
    %58 = vector.shape_cast %57 : vector<8xf32> to vector<8x1xf32>
    %59 = vector.broadcast %58 : vector<8x1xf32> to vector<8x8xf32>
    %60 = arith.divf %56, %59 : vector<8x8xf32>
    %cst_24 = arith.constant dense<0.000000e+00> : vector<8xf32>
    %61 = vector.multi_reduction <add>, %60, %cst_24 [1] : vector<8x8xf32> to vector<8xf32>
    %62 = vector.shape_cast %61 : vector<8xf32> to vector<8x1xf32>
    %63 = vector.extract_strided_slice %10 {offsets = [0, 24], sizes = [8, 8], strides = [1, 1]} : vector<8x32xf32> to vector<8x8xf32>
    %64 = vector.extract_strided_slice %11 {offsets = [0, 24], sizes = [8, 8], strides = [1, 1]} : vector<8x32xf32> to vector<8x8xf32>
    %cst_25 = arith.constant dense<0.000000e+00> : vector<8x8xf32>
    %65 = tpu.matmul %63, %64, %cst_25 {dimension_numbers = #tpu.dot_dimension_numbers<[1], [1], [0], [0], [0, 0, 1, 0], [], []>} : vector<8x8xf32>, vector<8x8xf32>, vector<8x8xf32> -> vector<8x8xf32>
    %cst_26 = arith.constant 0.353553385 : f32
    %66 = vector.broadcast %cst_26 : f32 to vector<8x8xf32>
    %67 = arith.mulf %65, %66 : vector<8x8xf32>
    %cst_27 = arith.constant dense<0xFF800000> : vector<8xf32>
    %68 = vector.multi_reduction <maximumf>, %67, %cst_27 [1] : vector<8x8xf32> to vector<8xf32>
    %69 = vector.shape_cast %68 : vector<8xf32> to vector<8x1xf32>
    %70 = vector.broadcast %69 : vector<8x1xf32> to vector<8x8xf32>
    %71 = arith.subf %67, %70 : vector<8x8xf32>
    %72 = math.exp %71 : vector<8x8xf32>
    %cst_28 = arith.constant dense<0.000000e+00> : vector<8xf32>
    %73 = vector.multi_reduction <add>, %72, %cst_28 [1] : vector<8x8xf32> to vector<8xf32>
    %74 = vector.shape_cast %73 : vector<8xf32> to vector<8x1xf32>
    %75 = vector.broadcast %74 : vector<8x1xf32> to vector<8x8xf32>
    %76 = arith.divf %72, %75 : vector<8x8xf32>
    %cst_29 = arith.constant dense<0.000000e+00> : vector<8xf32>
    %77 = vector.multi_reduction <add>, %76, %cst_29 [1] : vector<8x8xf32> to vector<8xf32>
    %78 = vector.shape_cast %77 : vector<8xf32> to vector<8x1xf32>
    %cst_30 = arith.constant 0.000000e+00 : f32
    %79 = vector.broadcast %cst_30 : f32 to vector<8x32xf32>
    %80 = vector.extract_strided_slice %30 {offsets = [0, 0], sizes = [1, 1], strides = [1, 1]} : vector<8x1xf32> to vector<1x1xf32>
    %81 = vector.extract_strided_slice %14 {offsets = [0, 0], sizes = [1, 8], strides = [1, 1]} : vector<1x32xf32> to vector<1x8xf32>
    %82 = vector.broadcast %80 : vector<1x1xf32> to vector<1x8xf32>
    %83 = arith.mulf %82, %81 : vector<1x8xf32>
    %84 = vector.extract_strided_slice %30 {offsets = [4, 0], sizes = [1, 1], strides = [1, 1]} : vector<8x1xf32> to vector<1x1xf32>
    %85 = vector.extract_strided_slice %14 {offsets = [0, 0], sizes = [1, 8], strides = [1, 1]} : vector<1x32xf32> to vector<1x8xf32>
    %86 = vector.broadcast %84 : vector<1x1xf32> to vector<1x8xf32>
    %87 = arith.mulf %86, %85 : vector<1x8xf32>
    %88 = vector.extract_strided_slice %46 {offsets = [0, 0], sizes = [1, 1], strides = [1, 1]} : vector<8x1xf32> to vector<1x1xf32>
    %89 = vector.extract_strided_slice %14 {offsets = [0, 8], sizes = [1, 8], strides = [1, 1]} : vector<1x32xf32> to vector<1x8xf32>
    %90 = vector.broadcast %88 : vector<1x1xf32> to vector<1x8xf32>
    %91 = arith.mulf %90, %89 : vector<1x8xf32>
    %92 = vector.extract_strided_slice %46 {offsets = [4, 0], sizes = [1, 1], strides = [1, 1]} : vector<8x1xf32> to vector<1x1xf32>
    %93 = vector.extract_strided_slice %14 {offsets = [0, 8], sizes = [1, 8], strides = [1, 1]} : vector<1x32xf32> to vector<1x8xf32>
    %94 = vector.broadcast %92 : vector<1x1xf32> to vector<1x8xf32>
    %95 = arith.mulf %94, %93 : vector<1x8xf32>
    %96 = vector.extract_strided_slice %62 {offsets = [0, 0], sizes = [1, 1], strides = [1, 1]} : vector<8x1xf32> to vector<1x1xf32>
    %97 = vector.extract_strided_slice %14 {offsets = [0, 16], sizes = [1, 8], strides = [1, 1]} : vector<1x32xf32> to vector<1x8xf32>
    %98 = vector.broadcast %96 : vector<1x1xf32> to vector<1x8xf32>
    %99 = arith.mulf %98, %97 : vector<1x8xf32>
    %100 = vector.extract_strided_slice %62 {offsets = [4, 0], sizes = [1, 1], strides = [1, 1]} : vector<8x1xf32> to vector<1x1xf32>
    %101 = vector.extract_strided_slice %14 {offsets = [0, 16], sizes = [1, 8], strides = [1, 1]} : vector<1x32xf32> to vector<1x8xf32>
    %102 = vector.broadcast %100 : vector<1x1xf32> to vector<1x8xf32>
    %103 = arith.mulf %102, %101 : vector<1x8xf32>
    %104 = vector.extract_strided_slice %78 {offsets = [0, 0], sizes = [1, 1], strides = [1, 1]} : vector<8x1xf32> to vector<1x1xf32>
    %105 = vector.extract_strided_slice %14 {offsets = [0, 24], sizes = [1, 8], strides = [1, 1]} : vector<1x32xf32> to vector<1x8xf32>
    %106 = vector.broadcast %104 : vector<1x1xf32> to vector<1x8xf32>
    %107 = arith.mulf %106, %105 : vector<1x8xf32>
    %108 = vector.extract_strided_slice %78 {offsets = [4, 0], sizes = [1, 1], strides = [1, 1]} : vector<8x1xf32> to vector<1x1xf32>
    %109 = vector.extract_strided_slice %14 {offsets = [0, 24], sizes = [1, 8], strides = [1, 1]} : vector<1x32xf32> to vector<1x8xf32>
    %110 = vector.broadcast %108 : vector<1x1xf32> to vector<1x8xf32>
    %111 = arith.mulf %110, %109 : vector<1x8xf32>
    %112 = tpu.concatenate %83, %87, %91, %95, %99, %103, %107, %111 in 0 : vector<1x8xf32>, vector<1x8xf32>, vector<1x8xf32>, vector<1x8xf32>, vector<1x8xf32>, vector<1x8xf32>, vector<1x8xf32>, vector<1x8xf32> -> vector<8x8xf32>
    %113 = arith.truncf %112 : vector<8x8xf32> to vector<8x8xbf16>
    %114 = vector.extract_strided_slice %7 {offsets = [0, 0], sizes = [8, 32], strides = [1, 1]} : vector<32x32xbf16> to vector<8x32xbf16>
    %cst_31 = arith.constant dense<0.000000e+00> : vector<8x32xf32>
    %115 = tpu.matmul %113, %114, %cst_31 {dimension_numbers = #tpu.dot_dimension_numbers<[1], [0], [0], [1], [0, 0, 1, 1], [], []>} : vector<8x8xbf16>, vector<8x32xbf16>, vector<8x32xf32> -> vector<8x32xf32>
    %116 = arith.addf %79, %115 : vector<8x32xf32>
    %117 = vector.extract_strided_slice %30 {offsets = [1, 0], sizes = [1, 1], strides = [1, 1]} : vector<8x1xf32> to vector<1x1xf32>
    %118 = vector.extract_strided_slice %14 {offsets = [0, 0], sizes = [1, 8], strides = [1, 1]} : vector<1x32xf32> to vector<1x8xf32>
    %119 = vector.broadcast %117 : vector<1x1xf32> to vector<1x8xf32>
    %120 = arith.mulf %119, %118 : vector<1x8xf32>
    %121 = vector.extract_strided_slice %30 {offsets = [5, 0], sizes = [1, 1], strides = [1, 1]} : vector<8x1xf32> to vector<1x1xf32>
    %122 = vector.extract_strided_slice %14 {offsets = [0, 0], sizes = [1, 8], strides = [1, 1]} : vector<1x32xf32> to vector<1x8xf32>
    %123 = vector.broadcast %121 : vector<1x1xf32> to vector<1x8xf32>
    %124 = arith.mulf %123, %122 : vector<1x8xf32>
    %125 = vector.extract_strided_slice %46 {offsets = [1, 0], sizes = [1, 1], strides = [1, 1]} : vector<8x1xf32> to vector<1x1xf32>
    %126 = vector.extract_strided_slice %14 {offsets = [0, 8], sizes = [1, 8], strides = [1, 1]} : vector<1x32xf32> to vector<1x8xf32>
    %127 = vector.broadcast %125 : vector<1x1xf32> to vector<1x8xf32>
    %128 = arith.mulf %127, %126 : vector<1x8xf32>
    %129 = vector.extract_strided_slice %46 {offsets = [5, 0], sizes = [1, 1], strides = [1, 1]} : vector<8x1xf32> to vector<1x1xf32>
    %130 = vector.extract_strided_slice %14 {offsets = [0, 8], sizes = [1, 8], strides = [1, 1]} : vector<1x32xf32> to vector<1x8xf32>
    %131 = vector.broadcast %129 : vector<1x1xf32> to vector<1x8xf32>
    %132 = arith.mulf %131, %130 : vector<1x8xf32>
    %133 = vector.extract_strided_slice %62 {offsets = [1, 0], sizes = [1, 1], strides = [1, 1]} : vector<8x1xf32> to vector<1x1xf32>
    %134 = vector.extract_strided_slice %14 {offsets = [0, 16], sizes = [1, 8], strides = [1, 1]} : vector<1x32xf32> to vector<1x8xf32>
    %135 = vector.broadcast %133 : vector<1x1xf32> to vector<1x8xf32>
    %136 = arith.mulf %135, %134 : vector<1x8xf32>
    %137 = vector.extract_strided_slice %62 {offsets = [5, 0], sizes = [1, 1], strides = [1, 1]} : vector<8x1xf32> to vector<1x1xf32>
    %138 = vector.extract_strided_slice %14 {offsets = [0, 16], sizes = [1, 8], strides = [1, 1]} : vector<1x32xf32> to vector<1x8xf32>
    %139 = vector.broadcast %137 : vector<1x1xf32> to vector<1x8xf32>
    %140 = arith.mulf %139, %138 : vector<1x8xf32>
    %141 = vector.extract_strided_slice %78 {offsets = [1, 0], sizes = [1, 1], strides = [1, 1]} : vector<8x1xf32> to vector<1x1xf32>
    %142 = vector.extract_strided_slice %14 {offsets = [0, 24], sizes = [1, 8], strides = [1, 1]} : vector<1x32xf32> to vector<1x8xf32>
    %143 = vector.broadcast %141 : vector<1x1xf32> to vector<1x8xf32>
    %144 = arith.mulf %143, %142 : vector<1x8xf32>
    %145 = vector.extract_strided_slice %78 {offsets = [5, 0], sizes = [1, 1], strides = [1, 1]} : vector<8x1xf32> to vector<1x1xf32>
    %146 = vector.extract_strided_slice %14 {offsets = [0, 24], sizes = [1, 8], strides = [1, 1]} : vector<1x32xf32> to vector<1x8xf32>
    %147 = vector.broadcast %145 : vector<1x1xf32> to vector<1x8xf32>
    %148 = arith.mulf %147, %146 : vector<1x8xf32>
    %149 = tpu.concatenate %120, %124, %128, %132, %136, %140, %144, %148 in 0 : vector<1x8xf32>, vector<1x8xf32>, vector<1x8xf32>, vector<1x8xf32>, vector<1x8xf32>, vector<1x8xf32>, vector<1x8xf32>, vector<1x8xf32> -> vector<8x8xf32>
    %150 = arith.truncf %149 : vector<8x8xf32> to vector<8x8xbf16>
    %151 = vector.extract_strided_slice %7 {offsets = [8, 0], sizes = [8, 32], strides = [1, 1]} : vector<32x32xbf16> to vector<8x32xbf16>
    %cst_32 = arith.constant dense<0.000000e+00> : vector<8x32xf32>
    %152 = tpu.matmul %150, %151, %cst_32 {dimension_numbers = #tpu.dot_dimension_numbers<[1], [0], [0], [1], [0, 0, 1, 1], [], []>} : vector<8x8xbf16>, vector<8x32xbf16>, vector<8x32xf32> -> vector<8x32xf32>
    %153 = arith.addf %116, %152 : vector<8x32xf32>
    %154 = vector.extract_strided_slice %30 {offsets = [2, 0], sizes = [1, 1], strides = [1, 1]} : vector<8x1xf32> to vector<1x1xf32>
    %155 = vector.extract_strided_slice %14 {offsets = [0, 0], sizes = [1, 8], strides = [1, 1]} : vector<1x32xf32> to vector<1x8xf32>
    %156 = vector.broadcast %154 : vector<1x1xf32> to vector<1x8xf32>
    %157 = arith.mulf %156, %155 : vector<1x8xf32>
    %158 = vector.extract_strided_slice %30 {offsets = [6, 0], sizes = [1, 1], strides = [1, 1]} : vector<8x1xf32> to vector<1x1xf32>
    %159 = vector.extract_strided_slice %14 {offsets = [0, 0], sizes = [1, 8], strides = [1, 1]} : vector<1x32xf32> to vector<1x8xf32>
    %160 = vector.broadcast %158 : vector<1x1xf32> to vector<1x8xf32>
    %161 = arith.mulf %160, %159 : vector<1x8xf32>
    %162 = vector.extract_strided_slice %46 {offsets = [2, 0], sizes = [1, 1], strides = [1, 1]} : vector<8x1xf32> to vector<1x1xf32>
    %163 = vector.extract_strided_slice %14 {offsets = [0, 8], sizes = [1, 8], strides = [1, 1]} : vector<1x32xf32> to vector<1x8xf32>
    %164 = vector.broadcast %162 : vector<1x1xf32> to vector<1x8xf32>
    %165 = arith.mulf %164, %163 : vector<1x8xf32>
    %166 = vector.extract_strided_slice %46 {offsets = [6, 0], sizes = [1, 1], strides = [1, 1]} : vector<8x1xf32> to vector<1x1xf32>
    %167 = vector.extract_strided_slice %14 {offsets = [0, 8], sizes = [1, 8], strides = [1, 1]} : vector<1x32xf32> to vector<1x8xf32>
    %168 = vector.broadcast %166 : vector<1x1xf32> to vector<1x8xf32>
    %169 = arith.mulf %168, %167 : vector<1x8xf32>
    %170 = vector.extract_strided_slice %62 {offsets = [2, 0], sizes = [1, 1], strides = [1, 1]} : vector<8x1xf32> to vector<1x1xf32>
    %171 = vector.extract_strided_slice %14 {offsets = [0, 16], sizes = [1, 8], strides = [1, 1]} : vector<1x32xf32> to vector<1x8xf32>
    %172 = vector.broadcast %170 : vector<1x1xf32> to vector<1x8xf32>
    %173 = arith.mulf %172, %171 : vector<1x8xf32>
    %174 = vector.extract_strided_slice %62 {offsets = [6, 0], sizes = [1, 1], strides = [1, 1]} : vector<8x1xf32> to vector<1x1xf32>
    %175 = vector.extract_strided_slice %14 {offsets = [0, 16], sizes = [1, 8], strides = [1, 1]} : vector<1x32xf32> to vector<1x8xf32>
    %176 = vector.broadcast %174 : vector<1x1xf32> to vector<1x8xf32>
    %177 = arith.mulf %176, %175 : vector<1x8xf32>
    %178 = vector.extract_strided_slice %78 {offsets = [2, 0], sizes = [1, 1], strides = [1, 1]} : vector<8x1xf32> to vector<1x1xf32>
    %179 = vector.extract_strided_slice %14 {offsets = [0, 24], sizes = [1, 8], strides = [1, 1]} : vector<1x32xf32> to vector<1x8xf32>
    %180 = vector.broadcast %178 : vector<1x1xf32> to vector<1x8xf32>
    %181 = arith.mulf %180, %179 : vector<1x8xf32>
    %182 = vector.extract_strided_slice %78 {offsets = [6, 0], sizes = [1, 1], strides = [1, 1]} : vector<8x1xf32> to vector<1x1xf32>
    %183 = vector.extract_strided_slice %14 {offsets = [0, 24], sizes = [1, 8], strides = [1, 1]} : vector<1x32xf32> to vector<1x8xf32>
    %184 = vector.broadcast %182 : vector<1x1xf32> to vector<1x8xf32>
    %185 = arith.mulf %184, %183 : vector<1x8xf32>
    %186 = tpu.concatenate %157, %161, %165, %169, %173, %177, %181, %185 in 0 : vector<1x8xf32>, vector<1x8xf32>, vector<1x8xf32>, vector<1x8xf32>, vector<1x8xf32>, vector<1x8xf32>, vector<1x8xf32>, vector<1x8xf32> -> vector<8x8xf32>
    %187 = arith.truncf %186 : vector<8x8xf32> to vector<8x8xbf16>
    %188 = vector.extract_strided_slice %7 {offsets = [16, 0], sizes = [8, 32], strides = [1, 1]} : vector<32x32xbf16> to vector<8x32xbf16>
    %cst_33 = arith.constant dense<0.000000e+00> : vector<8x32xf32>
    %189 = tpu.matmul %187, %188, %cst_33 {dimension_numbers = #tpu.dot_dimension_numbers<[1], [0], [0], [1], [0, 0, 1, 1], [], []>} : vector<8x8xbf16>, vector<8x32xbf16>, vector<8x32xf32> -> vector<8x32xf32>
    %190 = arith.addf %153, %189 : vector<8x32xf32>
    %191 = vector.extract_strided_slice %30 {offsets = [3, 0], sizes = [1, 1], strides = [1, 1]} : vector<8x1xf32> to vector<1x1xf32>
    %192 = vector.extract_strided_slice %14 {offsets = [0, 0], sizes = [1, 8], strides = [1, 1]} : vector<1x32xf32> to vector<1x8xf32>
    %193 = vector.broadcast %191 : vector<1x1xf32> to vector<1x8xf32>
    %194 = arith.mulf %193, %192 : vector<1x8xf32>
    %195 = vector.extract_strided_slice %30 {offsets = [7, 0], sizes = [1, 1], strides = [1, 1]} : vector<8x1xf32> to vector<1x1xf32>
    %196 = vector.extract_strided_slice %14 {offsets = [0, 0], sizes = [1, 8], strides = [1, 1]} : vector<1x32xf32> to vector<1x8xf32>
    %197 = vector.broadcast %195 : vector<1x1xf32> to vector<1x8xf32>
    %198 = arith.mulf %197, %196 : vector<1x8xf32>
    %199 = vector.extract_strided_slice %46 {offsets = [3, 0], sizes = [1, 1], strides = [1, 1]} : vector<8x1xf32> to vector<1x1xf32>
    %200 = vector.extract_strided_slice %14 {offsets = [0, 8], sizes = [1, 8], strides = [1, 1]} : vector<1x32xf32> to vector<1x8xf32>
    %201 = vector.broadcast %199 : vector<1x1xf32> to vector<1x8xf32>
    %202 = arith.mulf %201, %200 : vector<1x8xf32>
    %203 = vector.extract_strided_slice %46 {offsets = [7, 0], sizes = [1, 1], strides = [1, 1]} : vector<8x1xf32> to vector<1x1xf32>
    %204 = vector.extract_strided_slice %14 {offsets = [0, 8], sizes = [1, 8], strides = [1, 1]} : vector<1x32xf32> to vector<1x8xf32>
    %205 = vector.broadcast %203 : vector<1x1xf32> to vector<1x8xf32>
    %206 = arith.mulf %205, %204 : vector<1x8xf32>
    %207 = vector.extract_strided_slice %62 {offsets = [3, 0], sizes = [1, 1], strides = [1, 1]} : vector<8x1xf32> to vector<1x1xf32>
    %208 = vector.extract_strided_slice %14 {offsets = [0, 16], sizes = [1, 8], strides = [1, 1]} : vector<1x32xf32> to vector<1x8xf32>
    %209 = vector.broadcast %207 : vector<1x1xf32> to vector<1x8xf32>
    %210 = arith.mulf %209, %208 : vector<1x8xf32>
    %211 = vector.extract_strided_slice %62 {offsets = [7, 0], sizes = [1, 1], strides = [1, 1]} : vector<8x1xf32> to vector<1x1xf32>
    %212 = vector.extract_strided_slice %14 {offsets = [0, 16], sizes = [1, 8], strides = [1, 1]} : vector<1x32xf32> to vector<1x8xf32>
    %213 = vector.broadcast %211 : vector<1x1xf32> to vector<1x8xf32>
    %214 = arith.mulf %213, %212 : vector<1x8xf32>
    %215 = vector.extract_strided_slice %78 {offsets = [3, 0], sizes = [1, 1], strides = [1, 1]} : vector<8x1xf32> to vector<1x1xf32>
    %216 = vector.extract_strided_slice %14 {offsets = [0, 24], sizes = [1, 8], strides = [1, 1]} : vector<1x32xf32> to vector<1x8xf32>
    %217 = vector.broadcast %215 : vector<1x1xf32> to vector<1x8xf32>
    %218 = arith.mulf %217, %216 : vector<1x8xf32>
    %219 = vector.extract_strided_slice %78 {offsets = [7, 0], sizes = [1, 1], strides = [1, 1]} : vector<8x1xf32> to vector<1x1xf32>
    %220 = vector.extract_strided_slice %14 {offsets = [0, 24], sizes = [1, 8], strides = [1, 1]} : vector<1x32xf32> to vector<1x8xf32>
    %221 = vector.broadcast %219 : vector<1x1xf32> to vector<1x8xf32>
    %222 = arith.mulf %221, %220 : vector<1x8xf32>
    %223 = tpu.concatenate %194, %198, %202, %206, %210, %214, %218, %222 in 0 : vector<1x8xf32>, vector<1x8xf32>, vector<1x8xf32>, vector<1x8xf32>, vector<1x8xf32>, vector<1x8xf32>, vector<1x8xf32>, vector<1x8xf32> -> vector<8x8xf32>
    %224 = arith.truncf %223 : vector<8x8xf32> to vector<8x8xbf16>
    %225 = vector.extract_strided_slice %7 {offsets = [24, 0], sizes = [8, 32], strides = [1, 1]} : vector<32x32xbf16> to vector<8x32xbf16>
    %cst_34 = arith.constant dense<0.000000e+00> : vector<8x32xf32>
    %226 = tpu.matmul %224, %225, %cst_34 {dimension_numbers = #tpu.dot_dimension_numbers<[1], [0], [0], [1], [0, 0, 1, 1], [], []>} : vector<8x8xbf16>, vector<8x32xbf16>, vector<8x32xf32> -> vector<8x32xf32>
    %227 = arith.addf %190, %226 : vector<8x32xf32>
    %228 = vector.broadcast %8 : vector<1x32xf32> to vector<8x32xf32>
    %229 = arith.addf %227, %228 : vector<8x32xf32>
    %c0_35 = arith.constant 0 : index
    %c0_36 = arith.constant 0 : index
    %230 = vector.load %arg6[%c0_35, %c0_36] : memref<16x32xf32, #tpu.memory_space<vmem>>, vector<8x32xf32>
    tpu.vector_store %arg6[%c0_35, %c0_36], %229 {strides = array<i32>} : memref<16x32xf32, #tpu.memory_space<vmem>>, vector<8x32xf32>,
    %231 = vector.extract_strided_slice %6 {offsets = [8, 0], sizes = [8, 96], strides = [1, 1]} : vector<16x96xf32> to vector<8x96xf32>
    %232 = vector.extract_strided_slice %231 {offsets = [0, 0], sizes = [8, 32], strides = [1, 1]} : vector<8x96xf32> to vector<8x32xf32>
    %233 = vector.extract_strided_slice %231 {offsets = [0, 32], sizes = [8, 32], strides = [1, 1]} : vector<8x96xf32> to vector<8x32xf32>
    %234 = vector.extract_strided_slice %231 {offsets = [0, 64], sizes = [8, 32], strides = [1, 1]} : vector<8x96xf32> to vector<8x32xf32>
    %cst_37 = arith.constant dense<0.000000e+00> : vector<32xf32>
    %235 = vector.multi_reduction <add>, %234, %cst_37 [0] : vector<8x32xf32> to vector<32xf32>
    %236 = vector.shape_cast %235 : vector<32xf32> to vector<1x32xf32>
    %237 = vector.extract_strided_slice %232 {offsets = [0, 0], sizes = [8, 8], strides = [1, 1]} : vector<8x32xf32> to vector<8x8xf32>
    %238 = vector.extract_strided_slice %233 {offsets = [0, 0], sizes = [8, 8], strides = [1, 1]} : vector<8x32xf32> to vector<8x8xf32>
    %cst_38 = arith.constant dense<0.000000e+00> : vector<8x8xf32>
    %239 = tpu.matmul %237, %238, %cst_38 {dimension_numbers = #tpu.dot_dimension_numbers<[1], [1], [0], [0], [0, 0, 1, 0], [], []>} : vector<8x8xf32>, vector<8x8xf32>, vector<8x8xf32> -> vector<8x8xf32>
    %cst_39 = arith.constant 0.353553385 : f32
    %240 = vector.broadcast %cst_39 : f32 to vector<8x8xf32>
    %241 = arith.mulf %239, %240 : vector<8x8xf32>
    %cst_40 = arith.constant dense<0xFF800000> : vector<8xf32>
    %242 = vector.multi_reduction <maximumf>, %241, %cst_40 [1] : vector<8x8xf32> to vector<8xf32>
    %243 = vector.shape_cast %242 : vector<8xf32> to vector<8x1xf32>
    %244 = vector.broadcast %243 : vector<8x1xf32> to vector<8x8xf32>
    %245 = arith.subf %241, %244 : vector<8x8xf32>
    %246 = math.exp %245 : vector<8x8xf32>
    %cst_41 = arith.constant dense<0.000000e+00> : vector<8xf32>
    %247 = vector.multi_reduction <add>, %246, %cst_41 [1] : vector<8x8xf32> to vector<8xf32>
    %248 = vector.shape_cast %247 : vector<8xf32> to vector<8x1xf32>
    %249 = vector.broadcast %248 : vector<8x1xf32> to vector<8x8xf32>
    %250 = arith.divf %246, %249 : vector<8x8xf32>
    %cst_42 = arith.constant dense<0.000000e+00> : vector<8xf32>
    %251 = vector.multi_reduction <add>, %250, %cst_42 [1] : vector<8x8xf32> to vector<8xf32>
    %252 = vector.shape_cast %251 : vector<8xf32> to vector<8x1xf32>
    %253 = vector.extract_strided_slice %232 {offsets = [0, 8], sizes = [8, 8], strides = [1, 1]} : vector<8x32xf32> to vector<8x8xf32>
    %254 = vector.extract_strided_slice %233 {offsets = [0, 8], sizes = [8, 8], strides = [1, 1]} : vector<8x32xf32> to vector<8x8xf32>
    %cst_43 = arith.constant dense<0.000000e+00> : vector<8x8xf32>
    %255 = tpu.matmul %253, %254, %cst_43 {dimension_numbers = #tpu.dot_dimension_numbers<[1], [1], [0], [0], [0, 0, 1, 0], [], []>} : vector<8x8xf32>, vector<8x8xf32>, vector<8x8xf32> -> vector<8x8xf32>
    %cst_44 = arith.constant 0.353553385 : f32
    %256 = vector.broadcast %cst_44 : f32 to vector<8x8xf32>
    %257 = arith.mulf %255, %256 : vector<8x8xf32>
    %cst_45 = arith.constant dense<0xFF800000> : vector<8xf32>
    %258 = vector.multi_reduction <maximumf>, %257, %cst_45 [1] : vector<8x8xf32> to vector<8xf32>
    %259 = vector.shape_cast %258 : vector<8xf32> to vector<8x1xf32>
    %260 = vector.broadcast %259 : vector<8x1xf32> to vector<8x8xf32>
    %261 = arith.subf %257, %260 : vector<8x8xf32>
    %262 = math.exp %261 : vector<8x8xf32>
    %cst_46 = arith.constant dense<0.000000e+00> : vector<8xf32>
    %263 = vector.multi_reduction <add>, %262, %cst_46 [1] : vector<8x8xf32> to vector<8xf32>
    %264 = vector.shape_cast %263 : vector<8xf32> to vector<8x1xf32>
    %265 = vector.broadcast %264 : vector<8x1xf32> to vector<8x8xf32>
    %266 = arith.divf %262, %265 : vector<8x8xf32>
    %cst_47 = arith.constant dense<0.000000e+00> : vector<8xf32>
    %267 = vector.multi_reduction <add>, %266, %cst_47 [1] : vector<8x8xf32> to vector<8xf32>
    %268 = vector.shape_cast %267 : vector<8xf32> to vector<8x1xf32>
    %269 = vector.extract_strided_slice %232 {offsets = [0, 16], sizes = [8, 8], strides = [1, 1]} : vector<8x32xf32> to vector<8x8xf32>
    %270 = vector.extract_strided_slice %233 {offsets = [0, 16], sizes = [8, 8], strides = [1, 1]} : vector<8x32xf32> to vector<8x8xf32>
    %cst_48 = arith.constant dense<0.000000e+00> : vector<8x8xf32>
    %271 = tpu.matmul %269, %270, %cst_48 {dimension_numbers = #tpu.dot_dimension_numbers<[1], [1], [0], [0], [0, 0, 1, 0], [], []>} : vector<8x8xf32>, vector<8x8xf32>, vector<8x8xf32> -> vector<8x8xf32>
    %cst_49 = arith.constant 0.353553385 : f32
    %272 = vector.broadcast %cst_49 : f32 to vector<8x8xf32>
    %273 = arith.mulf %271, %272 : vector<8x8xf32>
    %cst_50 = arith.constant dense<0xFF800000> : vector<8xf32>
    %274 = vector.multi_reduction <maximumf>, %273, %cst_50 [1] : vector<8x8xf32> to vector<8xf32>
    %275 = vector.shape_cast %274 : vector<8xf32> to vector<8x1xf32>
    %276 = vector.broadcast %275 : vector<8x1xf32> to vector<8x8xf32>
    %277 = arith.subf %273, %276 : vector<8x8xf32>
    %278 = math.exp %277 : vector<8x8xf32>
    %cst_51 = arith.constant dense<0.000000e+00> : vector<8xf32>
    %279 = vector.multi_reduction <add>, %278, %cst_51 [1] : vector<8x8xf32> to vector<8xf32>
    %280 = vector.shape_cast %279 : vector<8xf32> to vector<8x1xf32>
    %281 = vector.broadcast %280 : vector<8x1xf32> to vector<8x8xf32>
    %282 = arith.divf %278, %281 : vector<8x8xf32>
    %cst_52 = arith.constant dense<0.000000e+00> : vector<8xf32>
    %283 = vector.multi_reduction <add>, %282, %cst_52 [1] : vector<8x8xf32> to vector<8xf32>
    %284 = vector.shape_cast %283 : vector<8xf32> to vector<8x1xf32>
    %285 = vector.extract_strided_slice %232 {offsets = [0, 24], sizes = [8, 8], strides = [1, 1]} : vector<8x32xf32> to vector<8x8xf32>
    %286 = vector.extract_strided_slice %233 {offsets = [0, 24], sizes = [8, 8], strides = [1, 1]} : vector<8x32xf32> to vector<8x8xf32>
    %cst_53 = arith.constant dense<0.000000e+00> : vector<8x8xf32>
    %287 = tpu.matmul %285, %286, %cst_53 {dimension_numbers = #tpu.dot_dimension_numbers<[1], [1], [0], [0], [0, 0, 1, 0], [], []>} : vector<8x8xf32>, vector<8x8xf32>, vector<8x8xf32> -> vector<8x8xf32>
    %cst_54 = arith.constant 0.353553385 : f32
    %288 = vector.broadcast %cst_54 : f32 to vector<8x8xf32>
    %289 = arith.mulf %287, %288 : vector<8x8xf32>
    %cst_55 = arith.constant dense<0xFF800000> : vector<8xf32>
    %290 = vector.multi_reduction <maximumf>, %289, %cst_55 [1] : vector<8x8xf32> to vector<8xf32>
    %291 = vector.shape_cast %290 : vector<8xf32> to vector<8x1xf32>
    %292 = vector.broadcast %291 : vector<8x1xf32> to vector<8x8xf32>
    %293 = arith.subf %289, %292 : vector<8x8xf32>
    %294 = math.exp %293 : vector<8x8xf32>
    %cst_56 = arith.constant dense<0.000000e+00> : vector<8xf32>
    %295 = vector.multi_reduction <add>, %294, %cst_56 [1] : vector<8x8xf32> to vector<8xf32>
    %296 = vector.shape_cast %295 : vector<8xf32> to vector<8x1xf32>
    %297 = vector.broadcast %296 : vector<8x1xf32> to vector<8x8xf32>
    %298 = arith.divf %294, %297 : vector<8x8xf32>
    %cst_57 = arith.constant dense<0.000000e+00> : vector<8xf32>
    %299 = vector.multi_reduction <add>, %298, %cst_57 [1] : vector<8x8xf32> to vector<8xf32>
    %300 = vector.shape_cast %299 : vector<8xf32> to vector<8x1xf32>
    %cst_58 = arith.constant 0.000000e+00 : f32
    %301 = vector.broadcast %cst_58 : f32 to vector<8x32xf32>
    %302 = vector.extract_strided_slice %252 {offsets = [0, 0], sizes = [1, 1], strides = [1, 1]} : vector<8x1xf32> to vector<1x1xf32>
    %303 = vector.extract_strided_slice %236 {offsets = [0, 0], sizes = [1, 8], strides = [1, 1]} : vector<1x32xf32> to vector<1x8xf32>
    %304 = vector.broadcast %302 : vector<1x1xf32> to vector<1x8xf32>
    %305 = arith.mulf %304, %303 : vector<1x8xf32>
    %306 = vector.extract_strided_slice %252 {offsets = [4, 0], sizes = [1, 1], strides = [1, 1]} : vector<8x1xf32> to vector<1x1xf32>
    %307 = vector.extract_strided_slice %236 {offsets = [0, 0], sizes = [1, 8], strides = [1, 1]} : vector<1x32xf32> to vector<1x8xf32>
    %308 = vector.broadcast %306 : vector<1x1xf32> to vector<1x8xf32>
    %309 = arith.mulf %308, %307 : vector<1x8xf32>
    %310 = vector.extract_strided_slice %268 {offsets = [0, 0], sizes = [1, 1], strides = [1, 1]} : vector<8x1xf32> to vector<1x1xf32>
    %311 = vector.extract_strided_slice %236 {offsets = [0, 8], sizes = [1, 8], strides = [1, 1]} : vector<1x32xf32> to vector<1x8xf32>
    %312 = vector.broadcast %310 : vector<1x1xf32> to vector<1x8xf32>
    %313 = arith.mulf %312, %311 : vector<1x8xf32>
    %314 = vector.extract_strided_slice %268 {offsets = [4, 0], sizes = [1, 1], strides = [1, 1]} : vector<8x1xf32> to vector<1x1xf32>
    %315 = vector.extract_strided_slice %236 {offsets = [0, 8], sizes = [1, 8], strides = [1, 1]} : vector<1x32xf32> to vector<1x8xf32>
    %316 = vector.broadcast %314 : vector<1x1xf32> to vector<1x8xf32>
    %317 = arith.mulf %316, %315 : vector<1x8xf32>
    %318 = vector.extract_strided_slice %284 {offsets = [0, 0], sizes = [1, 1], strides = [1, 1]} : vector<8x1xf32> to vector<1x1xf32>
    %319 = vector.extract_strided_slice %236 {offsets = [0, 16], sizes = [1, 8], strides = [1, 1]} : vector<1x32xf32> to vector<1x8xf32>
    %320 = vector.broadcast %318 : vector<1x1xf32> to vector<1x8xf32>
    %321 = arith.mulf %320, %319 : vector<1x8xf32>
    %322 = vector.extract_strided_slice %284 {offsets = [4, 0], sizes = [1, 1], strides = [1, 1]} : vector<8x1xf32> to vector<1x1xf32>
    %323 = vector.extract_strided_slice %236 {offsets = [0, 16], sizes = [1, 8], strides = [1, 1]} : vector<1x32xf32> to vector<1x8xf32>
    %324 = vector.broadcast %322 : vector<1x1xf32> to vector<1x8xf32>
    %325 = arith.mulf %324, %323 : vector<1x8xf32>
    %326 = vector.extract_strided_slice %300 {offsets = [0, 0], sizes = [1, 1], strides = [1, 1]} : vector<8x1xf32> to vector<1x1xf32>
    %327 = vector.extract_strided_slice %236 {offsets = [0, 24], sizes = [1, 8], strides = [1, 1]} : vector<1x32xf32> to vector<1x8xf32>
    %328 = vector.broadcast %326 : vector<1x1xf32> to vector<1x8xf32>
    %329 = arith.mulf %328, %327 : vector<1x8xf32>
    %330 = vector.extract_strided_slice %300 {offsets = [4, 0], sizes = [1, 1], strides = [1, 1]} : vector<8x1xf32> to vector<1x1xf32>
    %331 = vector.extract_strided_slice %236 {offsets = [0, 24], sizes = [1, 8], strides = [1, 1]} : vector<1x32xf32> to vector<1x8xf32>
    %332 = vector.broadcast %330 : vector<1x1xf32> to vector<1x8xf32>
    %333 = arith.mulf %332, %331 : vector<1x8xf32>
    %334 = tpu.concatenate %305, %309, %313, %317, %321, %325, %329, %333 in 0 : vector<1x8xf32>, vector<1x8xf32>, vector<1x8xf32>, vector<1x8xf32>, vector<1x8xf32>, vector<1x8xf32>, vector<1x8xf32>, vector<1x8xf32> -> vector<8x8xf32>
    %335 = arith.truncf %334 : vector<8x8xf32> to vector<8x8xbf16>
    %336 = vector.extract_strided_slice %7 {offsets = [0, 0], sizes = [8, 32], strides = [1, 1]} : vector<32x32xbf16> to vector<8x32xbf16>
    %cst_59 = arith.constant dense<0.000000e+00> : vector<8x32xf32>
    %337 = tpu.matmul %335, %336, %cst_59 {dimension_numbers = #tpu.dot_dimension_numbers<[1], [0], [0], [1], [0, 0, 1, 1], [], []>} : vector<8x8xbf16>, vector<8x32xbf16>, vector<8x32xf32> -> vector<8x32xf32>
    %338 = arith.addf %301, %337 : vector<8x32xf32>
    %339 = vector.extract_strided_slice %252 {offsets = [1, 0], sizes = [1, 1], strides = [1, 1]} : vector<8x1xf32> to vector<1x1xf32>
    %340 = vector.extract_strided_slice %236 {offsets = [0, 0], sizes = [1, 8], strides = [1, 1]} : vector<1x32xf32> to vector<1x8xf32>
    %341 = vector.broadcast %339 : vector<1x1xf32> to vector<1x8xf32>
    %342 = arith.mulf %341, %340 : vector<1x8xf32>
    %343 = vector.extract_strided_slice %252 {offsets = [5, 0], sizes = [1, 1], strides = [1, 1]} : vector<8x1xf32> to vector<1x1xf32>
    %344 = vector.extract_strided_slice %236 {offsets = [0, 0], sizes = [1, 8], strides = [1, 1]} : vector<1x32xf32> to vector<1x8xf32>
    %345 = vector.broadcast %343 : vector<1x1xf32> to vector<1x8xf32>
    %346 = arith.mulf %345, %344 : vector<1x8xf32>
    %347 = vector.extract_strided_slice %268 {offsets = [1, 0], sizes = [1, 1], strides = [1, 1]} : vector<8x1xf32> to vector<1x1xf32>
    %348 = vector.extract_strided_slice %236 {offsets = [0, 8], sizes = [1, 8], strides = [1, 1]} : vector<1x32xf32> to vector<1x8xf32>
    %349 = vector.broadcast %347 : vector<1x1xf32> to vector<1x8xf32>
    %350 = arith.mulf %349, %348 : vector<1x8xf32>
    %351 = vector.extract_strided_slice %268 {offsets = [5, 0], sizes = [1, 1], strides = [1, 1]} : vector<8x1xf32> to vector<1x1xf32>
    %352 = vector.extract_strided_slice %236 {offsets = [0, 8], sizes = [1, 8], strides = [1, 1]} : vector<1x32xf32> to vector<1x8xf32>
    %353 = vector.broadcast %351 : vector<1x1xf32> to vector<1x8xf32>
    %354 = arith.mulf %353, %352 : vector<1x8xf32>
    %355 = vector.extract_strided_slice %284 {offsets = [1, 0], sizes = [1, 1], strides = [1, 1]} : vector<8x1xf32> to vector<1x1xf32>
    %356 = vector.extract_strided_slice %236 {offsets = [0, 16], sizes = [1, 8], strides = [1, 1]} : vector<1x32xf32> to vector<1x8xf32>
    %357 = vector.broadcast %355 : vector<1x1xf32> to vector<1x8xf32>
    %358 = arith.mulf %357, %356 : vector<1x8xf32>
    %359 = vector.extract_strided_slice %284 {offsets = [5, 0], sizes = [1, 1], strides = [1, 1]} : vector<8x1xf32> to vector<1x1xf32>
    %360 = vector.extract_strided_slice %236 {offsets = [0, 16], sizes = [1, 8], strides = [1, 1]} : vector<1x32xf32> to vector<1x8xf32>
    %361 = vector.broadcast %359 : vector<1x1xf32> to vector<1x8xf32>
    %362 = arith.mulf %361, %360 : vector<1x8xf32>
    %363 = vector.extract_strided_slice %300 {offsets = [1, 0], sizes = [1, 1], strides = [1, 1]} : vector<8x1xf32> to vector<1x1xf32>
    %364 = vector.extract_strided_slice %236 {offsets = [0, 24], sizes = [1, 8], strides = [1, 1]} : vector<1x32xf32> to vector<1x8xf32>
    %365 = vector.broadcast %363 : vector<1x1xf32> to vector<1x8xf32>
    %366 = arith.mulf %365, %364 : vector<1x8xf32>
    %367 = vector.extract_strided_slice %300 {offsets = [5, 0], sizes = [1, 1], strides = [1, 1]} : vector<8x1xf32> to vector<1x1xf32>
    %368 = vector.extract_strided_slice %236 {offsets = [0, 24], sizes = [1, 8], strides = [1, 1]} : vector<1x32xf32> to vector<1x8xf32>
    %369 = vector.broadcast %367 : vector<1x1xf32> to vector<1x8xf32>
    %370 = arith.mulf %369, %368 : vector<1x8xf32>
    %371 = tpu.concatenate %342, %346, %350, %354, %358, %362, %366, %370 in 0 : vector<1x8xf32>, vector<1x8xf32>, vector<1x8xf32>, vector<1x8xf32>, vector<1x8xf32>, vector<1x8xf32>, vector<1x8xf32>, vector<1x8xf32> -> vector<8x8xf32>
    %372 = arith.truncf %371 : vector<8x8xf32> to vector<8x8xbf16>
    %373 = vector.extract_strided_slice %7 {offsets = [8, 0], sizes = [8, 32], strides = [1, 1]} : vector<32x32xbf16> to vector<8x32xbf16>
    %cst_60 = arith.constant dense<0.000000e+00> : vector<8x32xf32>
    %374 = tpu.matmul %372, %373, %cst_60 {dimension_numbers = #tpu.dot_dimension_numbers<[1], [0], [0], [1], [0, 0, 1, 1], [], []>} : vector<8x8xbf16>, vector<8x32xbf16>, vector<8x32xf32> -> vector<8x32xf32>
    %375 = arith.addf %338, %374 : vector<8x32xf32>
    %376 = vector.extract_strided_slice %252 {offsets = [2, 0], sizes = [1, 1], strides = [1, 1]} : vector<8x1xf32> to vector<1x1xf32>
    %377 = vector.extract_strided_slice %236 {offsets = [0, 0], sizes = [1, 8], strides = [1, 1]} : vector<1x32xf32> to vector<1x8xf32>
    %378 = vector.broadcast %376 : vector<1x1xf32> to vector<1x8xf32>
    %379 = arith.mulf %378, %377 : vector<1x8xf32>
    %380 = vector.extract_strided_slice %252 {offsets = [6, 0], sizes = [1, 1], strides = [1, 1]} : vector<8x1xf32> to vector<1x1xf32>
    %381 = vector.extract_strided_slice %236 {offsets = [0, 0], sizes = [1, 8], strides = [1, 1]} : vector<1x32xf32> to vector<1x8xf32>
    %382 = vector.broadcast %380 : vector<1x1xf32> to vector<1x8xf32>
    %383 = arith.mulf %382, %381 : vector<1x8xf32>
    %384 = vector.extract_strided_slice %268 {offsets = [2, 0], sizes = [1, 1], strides = [1, 1]} : vector<8x1xf32> to vector<1x1xf32>
    %385 = vector.extract_strided_slice %236 {offsets = [0, 8], sizes = [1, 8], strides = [1, 1]} : vector<1x32xf32> to vector<1x8xf32>
    %386 = vector.broadcast %384 : vector<1x1xf32> to vector<1x8xf32>
    %387 = arith.mulf %386, %385 : vector<1x8xf32>
    %388 = vector.extract_strided_slice %268 {offsets = [6, 0], sizes = [1, 1], strides = [1, 1]} : vector<8x1xf32> to vector<1x1xf32>
    %389 = vector.extract_strided_slice %236 {offsets = [0, 8], sizes = [1, 8], strides = [1, 1]} : vector<1x32xf32> to vector<1x8xf32>
    %390 = vector.broadcast %388 : vector<1x1xf32> to vector<1x8xf32>
    %391 = arith.mulf %390, %389 : vector<1x8xf32>
    %392 = vector.extract_strided_slice %284 {offsets = [2, 0], sizes = [1, 1], strides = [1, 1]} : vector<8x1xf32> to vector<1x1xf32>
    %393 = vector.extract_strided_slice %236 {offsets = [0, 16], sizes = [1, 8], strides = [1, 1]} : vector<1x32xf32> to vector<1x8xf32>
    %394 = vector.broadcast %392 : vector<1x1xf32> to vector<1x8xf32>
    %395 = arith.mulf %394, %393 : vector<1x8xf32>
    %396 = vector.extract_strided_slice %284 {offsets = [6, 0], sizes = [1, 1], strides = [1, 1]} : vector<8x1xf32> to vector<1x1xf32>
    %397 = vector.extract_strided_slice %236 {offsets = [0, 16], sizes = [1, 8], strides = [1, 1]} : vector<1x32xf32> to vector<1x8xf32>
    %398 = vector.broadcast %396 : vector<1x1xf32> to vector<1x8xf32>
    %399 = arith.mulf %398, %397 : vector<1x8xf32>
    %400 = vector.extract_strided_slice %300 {offsets = [2, 0], sizes = [1, 1], strides = [1, 1]} : vector<8x1xf32> to vector<1x1xf32>
    %401 = vector.extract_strided_slice %236 {offsets = [0, 24], sizes = [1, 8], strides = [1, 1]} : vector<1x32xf32> to vector<1x8xf32>
    %402 = vector.broadcast %400 : vector<1x1xf32> to vector<1x8xf32>
    %403 = arith.mulf %402, %401 : vector<1x8xf32>
    %404 = vector.extract_strided_slice %300 {offsets = [6, 0], sizes = [1, 1], strides = [1, 1]} : vector<8x1xf32> to vector<1x1xf32>
    %405 = vector.extract_strided_slice %236 {offsets = [0, 24], sizes = [1, 8], strides = [1, 1]} : vector<1x32xf32> to vector<1x8xf32>
    %406 = vector.broadcast %404 : vector<1x1xf32> to vector<1x8xf32>
    %407 = arith.mulf %406, %405 : vector<1x8xf32>
    %408 = tpu.concatenate %379, %383, %387, %391, %395, %399, %403, %407 in 0 : vector<1x8xf32>, vector<1x8xf32>, vector<1x8xf32>, vector<1x8xf32>, vector<1x8xf32>, vector<1x8xf32>, vector<1x8xf32>, vector<1x8xf32> -> vector<8x8xf32>
    %409 = arith.truncf %408 : vector<8x8xf32> to vector<8x8xbf16>
    %410 = vector.extract_strided_slice %7 {offsets = [16, 0], sizes = [8, 32], strides = [1, 1]} : vector<32x32xbf16> to vector<8x32xbf16>
    %cst_61 = arith.constant dense<0.000000e+00> : vector<8x32xf32>
    %411 = tpu.matmul %409, %410, %cst_61 {dimension_numbers = #tpu.dot_dimension_numbers<[1], [0], [0], [1], [0, 0, 1, 1], [], []>} : vector<8x8xbf16>, vector<8x32xbf16>, vector<8x32xf32> -> vector<8x32xf32>
    %412 = arith.addf %375, %411 : vector<8x32xf32>
    %413 = vector.extract_strided_slice %252 {offsets = [3, 0], sizes = [1, 1], strides = [1, 1]} : vector<8x1xf32> to vector<1x1xf32>
    %414 = vector.extract_strided_slice %236 {offsets = [0, 0], sizes = [1, 8], strides = [1, 1]} : vector<1x32xf32> to vector<1x8xf32>
    %415 = vector.broadcast %413 : vector<1x1xf32> to vector<1x8xf32>
    %416 = arith.mulf %415, %414 : vector<1x8xf32>
    %417 = vector.extract_strided_slice %252 {offsets = [7, 0], sizes = [1, 1], strides = [1, 1]} : vector<8x1xf32> to vector<1x1xf32>
    %418 = vector.extract_strided_slice %236 {offsets = [0, 0], sizes = [1, 8], strides = [1, 1]} : vector<1x32xf32> to vector<1x8xf32>
    %419 = vector.broadcast %417 : vector<1x1xf32> to vector<1x8xf32>
    %420 = arith.mulf %419, %418 : vector<1x8xf32>
    %421 = vector.extract_strided_slice %268 {offsets = [3, 0], sizes = [1, 1], strides = [1, 1]} : vector<8x1xf32> to vector<1x1xf32>
    %422 = vector.extract_strided_slice %236 {offsets = [0, 8], sizes = [1, 8], strides = [1, 1]} : vector<1x32xf32> to vector<1x8xf32>
    %423 = vector.broadcast %421 : vector<1x1xf32> to vector<1x8xf32>
    %424 = arith.mulf %423, %422 : vector<1x8xf32>
    %425 = vector.extract_strided_slice %268 {offsets = [7, 0], sizes = [1, 1], strides = [1, 1]} : vector<8x1xf32> to vector<1x1xf32>
    %426 = vector.extract_strided_slice %236 {offsets = [0, 8], sizes = [1, 8], strides = [1, 1]} : vector<1x32xf32> to vector<1x8xf32>
    %427 = vector.broadcast %425 : vector<1x1xf32> to vector<1x8xf32>
    %428 = arith.mulf %427, %426 : vector<1x8xf32>
    %429 = vector.extract_strided_slice %284 {offsets = [3, 0], sizes = [1, 1], strides = [1, 1]} : vector<8x1xf32> to vector<1x1xf32>
    %430 = vector.extract_strided_slice %236 {offsets = [0, 16], sizes = [1, 8], strides = [1, 1]} : vector<1x32xf32> to vector<1x8xf32>
    %431 = vector.broadcast %429 : vector<1x1xf32> to vector<1x8xf32>
    %432 = arith.mulf %431, %430 : vector<1x8xf32>
    %433 = vector.extract_strided_slice %284 {offsets = [7, 0], sizes = [1, 1], strides = [1, 1]} : vector<8x1xf32> to vector<1x1xf32>
    %434 = vector.extract_strided_slice %236 {offsets = [0, 16], sizes = [1, 8], strides = [1, 1]} : vector<1x32xf32> to vector<1x8xf32>
    %435 = vector.broadcast %433 : vector<1x1xf32> to vector<1x8xf32>
    %436 = arith.mulf %435, %434 : vector<1x8xf32>
    %437 = vector.extract_strided_slice %300 {offsets = [3, 0], sizes = [1, 1], strides = [1, 1]} : vector<8x1xf32> to vector<1x1xf32>
    %438 = vector.extract_strided_slice %236 {offsets = [0, 24], sizes = [1, 8], strides = [1, 1]} : vector<1x32xf32> to vector<1x8xf32>
    %439 = vector.broadcast %437 : vector<1x1xf32> to vector<1x8xf32>
    %440 = arith.mulf %439, %438 : vector<1x8xf32>
    %441 = vector.extract_strided_slice %300 {offsets = [7, 0], sizes = [1, 1], strides = [1, 1]} : vector<8x1xf32> to vector<1x1xf32>
    %442 = vector.extract_strided_slice %236 {offsets = [0, 24], sizes = [1, 8], strides = [1, 1]} : vector<1x32xf32> to vector<1x8xf32>
    %443 = vector.broadcast %441 : vector<1x1xf32> to vector<1x8xf32>
    %444 = arith.mulf %443, %442 : vector<1x8xf32>
    %445 = tpu.concatenate %416, %420, %424, %428, %432, %436, %440, %444 in 0 : vector<1x8xf32>, vector<1x8xf32>, vector<1x8xf32>, vector<1x8xf32>, vector<1x8xf32>, vector<1x8xf32>, vector<1x8xf32>, vector<1x8xf32> -> vector<8x8xf32>
    %446 = arith.truncf %445 : vector<8x8xf32> to vector<8x8xbf16>
    %447 = vector.extract_strided_slice %7 {offsets = [24, 0], sizes = [8, 32], strides = [1, 1]} : vector<32x32xbf16> to vector<8x32xbf16>
    %cst_62 = arith.constant dense<0.000000e+00> : vector<8x32xf32>
    %448 = tpu.matmul %446, %447, %cst_62 {dimension_numbers = #tpu.dot_dimension_numbers<[1], [0], [0], [1], [0, 0, 1, 1], [], []>} : vector<8x8xbf16>, vector<8x32xbf16>, vector<8x32xf32> -> vector<8x32xf32>
    %449 = arith.addf %412, %448 : vector<8x32xf32>
    %450 = vector.broadcast %8 : vector<1x32xf32> to vector<8x32xf32>
    %451 = arith.addf %449, %450 : vector<8x32xf32>
    %c8 = arith.constant 8 : index
    %c0_63 = arith.constant 0 : index
    %452 = vector.load %arg6[%c8, %c0_63] : memref<16x32xf32, #tpu.memory_space<vmem>>, vector<8x32xf32>
    tpu.vector_store %arg6[%c8, %c0_63], %451 {strides = array<i32>} : memref<16x32xf32, #tpu.memory_space<vmem>>, vector<8x32xf32>,
    return
  }
  func.func @transform_0(%arg0: i32) -> (i32, i32) {
    %c0_i32 = arith.constant 0 : i32
    %c0_i32_0 = arith.constant 0 : i32
    %c0_i32_1 = arith.constant 0 : i32
    return %c0_i32, %c0_i32_0 : i32, i32
  }
  func.func @transform_1(%arg0: i32) -> (i32, i32) {
    %c0_i32 = arith.constant 0 : i32
    %c0_i32_0 = arith.constant 0 : i32
    %c0_i32_1 = arith.constant 0 : i32
    return %c0_i32, %c0_i32_0 : i32, i32
  }
  func.func @transform_2(%arg0: i32) -> (i32, i32) {
    %c0_i32 = arith.constant 0 : i32
    %c0_i32_0 = arith.constant 0 : i32
    %c0_i32_1 = arith.constant 0 : i32
    return %c0_i32, %c0_i32_0 : i32, i32
  }
  func.func @transform_3(%arg0: i32) -> (i32, i32) {
    %c0_i32 = arith.constant 0 : i32
    %c0_i32_0 = arith.constant 0 : i32
    %c0_i32_1 = arith.constant 0 : i32
    return %c0_i32, %c0_i32_0 : i32, i32
  }
  func.func @transform_4(%arg0: i32) -> (i32, i32) {
    %c0_i32 = arith.constant 0 : i32
    %c0_i32_0 = arith.constant 0 : i32
    %c0_i32_1 = arith.constant 0 : i32
    return %c0_i32, %c0_i32_0 : i32, i32
  }
  func.func @transform_5(%arg0: i32) -> (i32, i32) {
    %c0_i32 = arith.constant 0 : i32
    %c0_i32_0 = arith.constant 0 : i32
    %c0_i32_1 = arith.constant 0 : i32
    return %c0_i32, %c0_i32_0 : i32, i32
  }
}

</mosaic_0001>

<bundles_post_ra>
// kernel: self_attention.1
= control target key start
LH: loop header
LB: loop body
LE: loop exit
PB: predicated region body
PF: predicated region fallthrough
CT: control target
= control target key end

     0   :  { %v1858_v1 = vmov 0.0   ;;  %vm1859_vm0 = vmmov 0   ;;  %s2191_s0 = inlined_call_operand.vmem [shape: f32[16,32], index: 0, kind: input, shape index: {}]   ;;  %s2192_s1 = inlined_call_operand.vmem [shape: bf16[32,96], index: 1, kind: input, shape index: {}]   ;;  %s2193_s2 = inlined_call_operand.vmem [shape: f32[1,96], index: 2, kind: input, shape index: {}]   ;;  %s2194_s3 = inlined_call_operand.vmem [shape: bf16[32,32], index: 3, kind: input, shape index: {}]   ;;  %s2195_s4 = inlined_call_operand.vmem [shape: f32[1,32], index: 4, kind: input, shape index: {}]   ;;  %s2196_s5 = inlined_call_operand.hbm [shape: f32[16,32], index: 5, kind: output, shape index: {}]  }
   0x1   :  { %v1802_v0 = vld [vmem:[%s2192_s1 + $0x8] sm:$0xff]   ;;  %1603 = vmatprep.subr.bf16.mxu0 %v1858_v1  ;;  %1611 = vmatprep.subr.mxu1 %v1858_v1  ;;  %v1803_v2 = vld [vmem:[%s2192_s1] sm:$0xff]  }
   0x2   :  { %1604 = vmatpush3.bf16.msra.mxu0 %v1802_v0  ;;  %1607 = vmatprep.mubr.msk.bf16.mxu0 %vm1859_vm0, %v1858_v1  ;;  %v22_v3 = vld [vmem:[%s2191_s0] sm:$0xff]  ;;  %v23_v4 = vld [vmem:[%s2191_s0 + $0x8] sm:$0xff] }
   0x3   :  { %1605 = vmatprep.subr.bf16.mxu0 %v1858_v1  ;;  %1613 = vmatprep.mubr.msk.f32.mxu1 %vm1859_vm0, %v1858_v1 }
   0x4   :  { %10 = vsyncpa [#allocation3], 0  ;;  %v24_v5 = vpack.c.bf16 %v23_v4, %v22_v3  ;;  %vm48_vm1 = vcmask 261120   ;;  %v1539_v6 = vld [vmem:[%s2193_s2] ss:$0 sm:$0xff]  ;;  %s1860_s0 = smov 120  }
   0x5   :  { %s1861_s27 = smov 96   ;;  %s1862_s28 = smov 80   ;;  %vm109_vm2 = vcmask 64512   ;;  %vm98_vm3 = vcmask 785920   ;;  %vm518_vm4 = vcmask 1043456   ;;  %vm512_vm5 = vcmask 1040384  }
   0x6   :  { %1606 = vmatpush3.bf16.msra.mxu0 %v1803_v2  ;;  %s1863_s2 = smov 88   ;;  %s1864_s29 = smov 112   ;;  %vm514_vm6 = vcmask 1041408   ;;  %vm516_vm7 = vcmask 1042432   ;;  %vm520_vm8 = vcmask 1044480   ;;  %vm522_vm9 = vcmask 1045504  }
   0x7   :  { %1626 = vmatprep.subr.mxu0 %v1858_v1  ;;  %s1865_s30 = smov 72   ;;  %s1866_s6 = smov 104   ;;  %vm524_vm10 = vcmask 1046528  }
   0x8   :  { %s1867_s11 = smov 64  }
   0x9   :  { %1608 = vmatmul.mubr.msk.bf16.vlgmr.msra.gmra.mxu0 %vm48_vm1, %v24_v5 }
   0xa   :  { %1628 = vmatprep.mubr.msk.f32.mxu0 %vm1859_vm0, %v1858_v1 }
  0xc9   :  { %v86_v7 = vpop.f32.mrf.mxu0 }
  0xca   :  { %v1927_v8 = vadd.f32 %v1539_v6, %v86_v7 }
  0xcb   :  { %v1609_v9 = vpop.f32.mrf.mxu0 }
  0xcc   :  { %199 = vrot.lane.b32.xlu1 %v1927_v8, %s1860_s0  ;;  %107 = vrot.lane.b32.xlu0 %v1927_v8, %s1861_s27 }
  0xcd   :  { %v89_v10 = vpop.f32.mrf.mxu0 }
  0xce   :  { %v1933_v11 = vadd.f32 %v1539_v6, %v89_v10  ;;  %v99_v10 = vsel %vm98_vm3, %v1927_v8, 0.0 }
  0xcf   :  { %v1610_v12 = vpop.f32.mrf.mxu0 }
  0xd0   :  { %294 = vrot.lane.b32.xlu1 %v1927_v8, %s1862_s28  ;;  %201 = vrot.lane.b32.xlu0 %v1927_v8, %s1863_s2  ;;  %v100_v12 = vrot.slane %v99_v10, 4 }
  0xd4   :  { %292 = vrot.lane.b32.xlu1 %v1927_v8, %s1864_s29  ;;  %387 = vrot.lane.b32.xlu0 %v1927_v8, %s1865_s30 }
  0xd8   :  { %385 = vrot.lane.b32.xlu0 %v1927_v8, %s1866_s6 }
 0x13e   :  { %v200_v13 = vpop.permute.xlu1 %199  ;;  %v108_v14 = vpop.permute.xlu0 %107 }
 0x13f   :  { %1612 = vmatpush3.xpose.msk.msra.mxu1 %vm109_vm2, %v108_v14 }
 0x140   :  { %1616 = vmatprep.subr.mxu1 %v1858_v1 }
 0x142   :  { %1614 = vmatmul.mubr.msk.f32.vlgmr.msra.gmra.mxu1 %vm109_vm2, %v1927_v8  ;;  %v202_v15 = vpop.permute.xlu0 %201  ;;  %v295_v16 = vpop.permute.xlu1 %294 }
 0x143   :  { %1617 = vmatpush3.xpose.msk.msra.mxu1 %vm109_vm2, %v202_v15  ;;  %1618 = vmatprep.mubr.msk.f32.mxu1 %vm1859_vm0, %v1858_v1 }
 0x144   :  { %1621 = vmatprep.subr.mxu1 %v1858_v1 }
 0x146   :  { %1619 = vmatmul.mubr.msk.f32.vlgmr.msra.gmra.mxu1 %vm109_vm2, %v200_v13  ;;  %v388_v17 = vpop.permute.xlu0 %387  ;;  %v293_v18 = vpop.permute.xlu1 %292  ;;  %v101_v13 = vadd.f32 %v100_v12, %v99_v10 }
 0x147   :  { %1622 = vmatpush3.xpose.msk.msra.mxu1 %vm109_vm2, %v295_v16  ;;  %1627 = vmatpush3.xpose.msk.msra.mxu0 %vm109_vm2, %v388_v17 }
 0x148   :  { %1623 = vmatprep.mubr.msk.f32.mxu1 %vm1859_vm0, %v1858_v1  ;;  %1631 = vmatprep.subr.bf16.mxu1 %v1858_v1  ;;  %v102_v14 = vrot.slane %v101_v13, 2 }
 0x149   :  { %1637 = vmatprep.subr.bf16.mxu0 %v1858_v1 }
 0x14a   :  { %1624 = vmatmul.mubr.msk.f32.vlgmr.msra.gmra.mxu1 %vm109_vm2, %v293_v18  ;;  %v386_v19 = vpop.permute.xlu0 %385  ;;  %v103_v15 = vadd.f32 %v102_v14, %v101_v13 }
 0x14b   :  { %1629 = vmatmul.mubr.msk.f32.vlgmr.msra.gmra.mxu0 %vm109_vm2, %v386_v19  ;;  %1633 = vmatprep.mubr.msk.bf16.mxu1 %vm1859_vm0, %v1858_v1 }
 0x14c   :  { %1639 = vmatprep.mubr.msk.bf16.mxu0 %vm1859_vm0, %v1858_v1  ;;  %v104_v16 = vrot.slane %v103_v15, 1 }
 0x14e   :  { %v105_v18 = vadd.f32 %v104_v16, %v103_v15 }
 0x202   :  { %v180_v20 = vpop.f32.mrf.mxu1 }
 0x203   :  { %v184_v25 = vmul.f32 0.35355338, %v180_v20 }
 0x204   :  { %v1615_v21 = vpop.f32.mrf.mxu1 }
 0x205   :  { %v185_v33 = vsel %vm109_vm2, %v184_v25, -inf }
 0x206   :  { %v273_v22 = vpop.f32.mrf.mxu1 }
 0x207   :  { %v277_v23 = vmul.f32 0.35355338, %v273_v22 }
 0x208   :  { %v1620_v24 = vpop.f32.mrf.mxu1 }
 0x209   :  { %v278_v26 = vsel %vm109_vm2, %v277_v23, -inf }
 0x20a   :  { %279 = vmax.xlane.f32.xlu1 %v278_v26  ;;  %v366_v27 = vpop.f32.mrf.mxu1 }
 0x20b   :  { %v370_v28 = vmul.f32 0.35355338, %v366_v27  ;;  %v459_v29 = vpop.f32.mrf.mxu0 }
 0x20c   :  { %v1625_v30 = vpop.f32.mrf.mxu1  ;;  %v463_v31 = vmul.f32 0.35355338, %v459_v29 }
 0x20d   :  { %v1630_v32 = vpop.f32.mrf.mxu0  ;;  %v371_v34 = vsel %vm109_vm2, %v370_v28, -inf }
 0x20e   :  { %186 = vmax.xlane.f32.xlu1 %v185_v33  ;;  %372 = vmax.xlane.f32.xlu0 %v371_v34  ;;  %v464_v35 = vsel %vm109_vm2, %v463_v31, -inf }
 0x212   :  { %465 = vmax.xlane.f32.xlu0 %v464_v35 }
 0x293   :  { %v280_v36 = vpop.xlane.xlu1 %279 }
 0x294   :  { %v281_v37 = vsub.f32 %v277_v23, %v280_v36 }
 0x296   :  { %v282_v38 = vmul.f32 1.442695, %v281_v37 }
 0x297   :  { %v187_v39 = vpop.xlane.xlu1 %186  ;;  %v373_v40 = vpop.xlane.xlu0 %372 }
 0x298   :  { %1804 = vpow2.f32 %v282_v38  ;;  %v188_v41 = vsub.f32 %v184_v25, %v187_v39  ;;  %v374_v42 = vsub.f32 %v370_v28, %v373_v40 }
 0x29a   :  { %v375_v43 = vmul.f32 1.442695, %v374_v42  ;;  %v189_v44 = vmul.f32 1.442695, %v188_v41 }
 0x29b   :  { %v466_v45 = vpop.xlane.xlu0 %465 }
 0x29c   :  { %v467_v46 = vsub.f32 %v463_v31, %v466_v45  ;;  %1806 = vpow2.f32 %v375_v43 }
 0x29d   :  { %1808 = vpow2.f32 %v189_v44 }
 0x29e   :  { %v468_v47 = vmul.f32 1.442695, %v467_v46 }
 0x2a0   :  { %1810 = vpow2.f32 %v468_v47 }
 0x2a5   :  { %v1805_v48 = vpop.eup %1804 }
 0x2a6   :  { %v284_v49 = vsel %vm109_vm2, %v1805_v48, 0.0 }
 0x2a7   :  { %285 = vadd.xlane.f32.xlu0 %v284_v49 }
 0x2a9   :  { %v1807_v50 = vpop.eup %1806 }
 0x2aa   :  { %v377_v51 = vsel %vm109_vm2, %v1807_v50, 0.0  ;;  %v1809_v52 = vpop.eup %1808 }
 0x2ab   :  { %378 = vadd.xlane.f32.xlu1 %v377_v51  ;;  %v191_v55 = vsel %vm109_vm2, %v1809_v52, 0.0  ;;  %v93_v51 = vld [vmem:[%s2194_s3] sm:$0xf] }
 0x2ad   :  { %v1811_v53 = vpop.eup %1810 }
 0x2ae   :  { %v470_v54 = vsel %vm109_vm2, %v1811_v53, 0.0 }
 0x2af   :  { %471 = vadd.xlane.f32.xlu0 %v470_v54  ;;  %192 = vadd.xlane.f32.xlu1 %v191_v55 }
 0x330   :  { %v286_v56 = vpop.xlane.xlu0 %285 }
 0x331   :  { %1812 = vrcp.f32 %v286_v56 }
 0x334   :  { %v379_v57 = vpop.xlane.xlu1 %378 }
 0x335   :  { %1814 = vrcp.f32 %v379_v57 }
 0x338   :  { %v472_v58 = vpop.xlane.xlu0 %471  ;;  %v193_v59 = vpop.xlane.xlu1 %192 }
 0x339   :  { %1816 = vrcp.f32 %v472_v58 }
 0x33a   :  { %1818 = vrcp.f32 %v193_v59 }
 0x33e   :  { %v1813_v60 = vpop.eup %1812 }
 0x33f   :  { %v288_v61 = vmul.f32 %v1813_v60, %v1805_v48 }
 0x341   :  { %v289_v62 = vsel %vm109_vm2, %v288_v61, 0.0 }
 0x342   :  { %290 = vadd.xlane.f32.xlu0 %v289_v62  ;;  %v1815_v63 = vpop.eup %1814 }
 0x343   :  { %v381_v0 = vmul.f32 %v1815_v63, %v1807_v50  ;;  %v94_v50 = vld [vmem:[%s2194_s3 + $0x4] sm:$0xf] }
 0x345   :  { %v382_v3 = vsel %vm109_vm2, %v381_v0, 0.0 }
 0x346   :  { %v1817_v2 = vpop.eup %1816  ;;  %383 = vadd.xlane.f32.xlu1 %v382_v3 }
 0x347   :  { %v1819_v4 = vpop.eup %1818  ;;  %v474_v5 = vmul.f32 %v1817_v2, %v1811_v53  ;;  %v2002_v53 = vsel %vm518_vm4, %v93_v51, 0 }
 0x348   :  { %v195_v6 = vmul.f32 %v1819_v4, %v1809_v52  ;;  %v1999_v52 = vsel %vm518_vm4, %v94_v50, 0  ;;  %1638 = vmatpush3.bf16.msra.mxu0 %v2002_v53 }
 0x349   :  { %v475_v7 = vsel %vm109_vm2, %v474_v5, 0.0  ;;  %1632 = vmatpush3.bf16.msra.mxu1 %v1999_v52  ;;  %1649 = vmatprep.subr.bf16.mxu0 %v1858_v1 }
 0x34a   :  { %v196_v9 = vsel %vm109_vm2, %v195_v6, 0.0  ;;  %476 = vadd.xlane.f32.xlu0 %v475_v7  ;;  %1643 = vmatprep.subr.bf16.mxu1 %v1858_v1 }
 0x34b   :  { %197 = vadd.xlane.f32.xlu1 %v196_v9 }
 0x3cb   :  { %v291_v17 = vpop.xlane.xlu0 %290 }
 0x3cc   :  { %v479_v19 = vmul.f32 %v291_v17, %v105_v18 }
 0x3ce   :  { %v486_v27 = vrot.slane %v479_v19, 6  ;;  %v490_v28 = vrot.slane %v479_v19, 1  ;;  %v531_v29 = vrot.slane %v479_v19, 7  ;;  %v535_v32 = vrot.slane %v479_v19, 2 }
 0x3cf   :  { %v384_v22 = vpop.xlane.xlu1 %383  ;;  %v667_v38 = vrot.slane %v479_v19, 3  ;;  %v747_v47 = vrot.slane %v479_v19, 4 }
 0x3d0   :  { %v480_v30 = vmul.f32 %v384_v22, %v105_v18  ;;  %v1727_v33 = vpack.i.bf16 %v490_v28, %v486_v27  ;;  %v1722_v34 = vpack.i.bf16 %v535_v32, %v531_v29 }
 0x3d1   :  { %v1737_v43 = vpack.i.bf16 %v667_v38, %v479_v19 }
 0x3d2   :  { %v539_v35 = vrot.slane %v480_v30, 5  ;;  %v495_v36 = vrot.slane %v480_v30, 4  ;;  %v499_v37 = vrot.slane %v480_v30, 7  ;;  %v671_v41 = vrot.slane %v480_v30, 6 }
 0x3d3   :  { %v477_v20 = vpop.xlane.xlu0 %476  ;;  %v675_v42 = vrot.slane %v480_v30, 1  ;;  %v751_v49 = vrot.slane %v480_v30, 2 }
 0x3d4   :  { %v481_v21 = vmul.f32 %v477_v20, %v105_v18  ;;  %v1732_v39 = vpack.i.bf16 %v480_v30, %v539_v35  ;;  %v1742_v40 = vpack.i.bf16 %v499_v37, %v495_v36  ;;  %v198_v54 = vpop.xlane.xlu1 %197 }
 0x3d5   :  { %v1747_v44 = vpack.i.bf16 %v675_v42, %v671_v41  ;;  %v478_v55 = vmul.f32 %v198_v54, %v105_v18 }
 0x3d6   :  { %v546_v23 = vrot.slane %v481_v21, 3  ;;  %v550_v24 = vrot.slane %v481_v21, 6  ;;  %v504_v25 = vrot.slane %v481_v21, 2  ;;  %v508_v26 = vrot.slane %v481_v21, 5 }
 0x3d7   :  { %v679_v45 = vrot.slane %v481_v21, 4  ;;  %v683_v46 = vrot.slane %v481_v21, 7  ;;  %v483_v58 = vrot.slane %v478_v55, 3  ;;  %v527_v59 = vrot.slane %v478_v55, 1 }
 0x3d8   :  { %v1712_v8 = vpack.i.bf16 %v550_v24, %v546_v23  ;;  %v1717_v31 = vpack.i.bf16 %v508_v26, %v504_v25  ;;  %v529_v60 = vrot.slane %v478_v55, 4  ;;  %v745_v6 = vrot.slane %v478_v55, 6 }
 0x3d9   :  { %v1752_v48 = vpack.i.bf16 %v683_v46, %v679_v45  ;;  %v513_v63 = vsel %vm512_vm5, %v478_v55, %v483_v58  ;;  %v660_v13 = vrot.slane %v478_v55, 2  ;;  %v662_v20 = vrot.slane %v478_v55, 5 }
 0x3da   :  { %1713 = vrot.lane.b32.xlu1 %v1712_v8, %s1866_s6  ;;  %1718 = vrot.lane.b32.xlu0 %v1717_v31, %s1866_s6  ;;  %v554_v4 = vsel %vm512_vm5, %v527_v59, %v529_v60 }
 0x3de   :  { %1728 = vrot.lane.b32.xlu1 %v1727_v33, %s1860_s0  ;;  %1723 = vrot.lane.b32.xlu0 %v1722_v34, %s1860_s0  ;;  %v687_v33 = vsel %vm512_vm5, %v660_v13, %v662_v20 }
 0x3e2   :  { %1733 = vrot.lane.b32.xlu1 %v1732_v39, %s1864_s29  ;;  %1743 = vrot.lane.b32.xlu0 %v1742_v40, %s1864_s29 }
 0x3e6   :  { %1738 = vrot.lane.b32.xlu1 %v1737_v43, %s1860_s0  ;;  %1748 = vrot.lane.b32.xlu0 %v1747_v44, %s1864_s29 }
 0x3ea   :  { %748 = vrot.lane.b32.xlu1 %v747_v47, %s1860_s0  ;;  %1753 = vrot.lane.b32.xlu0 %v1752_v48, %s1866_s6 }
 0x3ee   :  { %752 = vrot.lane.b32.xlu1 %v751_v49, %s1864_s29  ;;  %755 = vrot.lane.b32.xlu0 %v481_v21, %s1866_s6  ;;  %v758_v21 = vsel %vm512_vm5, %v483_v58, %v745_v6 }
 0x44c   :  { %v1714_v56 = vpop.permute.xlu1 %1713  ;;  %v2008_v57 = vpop.permute.xlu0 %1718 }
 0x44d   :  { %v1715_v24 = vunpack.i.l.bf16 %v1714_v56  ;;  %v1720_v25 = vunpack.i.l.bf16 %v2008_v57  ;;  %v1716_v30 = vunpack.i.h.bf16 %v1714_v56  ;;  %v1721_v8 = vunpack.i.h.bf16 %v2008_v57 }
 0x450   :  { %v1729_v61 = vpop.permute.xlu1 %1728  ;;  %v1724_v62 = vpop.permute.xlu0 %1723 }
 0x451   :  { %v1730_v0 = vunpack.i.l.bf16 %v1729_v61  ;;  %v1725_v2 = vunpack.i.l.bf16 %v1724_v62  ;;  %v1731_v3 = vunpack.i.h.bf16 %v1729_v61  ;;  %v1726_v5 = vunpack.i.h.bf16 %v1724_v62 }
 0x453   :  { %v515_v7 = vsel %vm514_vm6, %v513_v63, %v1730_v0  ;;  %v555_v9 = vsel %vm514_vm6, %v554_v4, %v1725_v2  ;;  %v759_v34 = vsel %vm514_vm6, %v758_v21, %v1731_v3  ;;  %v95_v0 = vld [vmem:[%s2194_s3 + $0x8] sm:$0xf]  ;;  %v96_v2 = vld [vmem:[%s2194_s3 + $0xc] sm:$0xf] }
 0x454   :  { %v1734_v10 = vpop.permute.xlu1 %1733  ;;  %v1744_v12 = vpop.permute.xlu0 %1743  ;;  %v517_v18 = vsel %vm516_vm7, %v515_v7, %v1731_v3  ;;  %v556_v19 = vsel %vm516_vm7, %v555_v9, %v1726_v5  ;;  %v2065_v3 = vsel %vm518_vm4, %v95_v0, 0  ;;  %v2068_v4 = vsel %vm518_vm4, %v96_v2, 0 }
 0x455   :  { %v1736_v14 = vunpack.i.h.bf16 %v1734_v10  ;;  %v1735_v15 = vunpack.i.l.bf16 %v1734_v10  ;;  %v1746_v16 = vunpack.i.h.bf16 %v1744_v12  ;;  %v1745_v17 = vunpack.i.l.bf16 %v1744_v12 }
 0x457   :  { %v557_v22 = vsel %vm518_vm4, %v556_v19, %v1735_v15  ;;  %v519_v23 = vsel %vm518_vm4, %v517_v18, %v1745_v17 }
 0x458   :  { %v558_v26 = vsel %vm520_vm8, %v557_v22, %v1736_v14  ;;  %v521_v27 = vsel %vm520_vm8, %v519_v23, %v1746_v16  ;;  %v1739_v28 = vpop.permute.xlu1 %1738  ;;  %v1749_v29 = vpop.permute.xlu0 %1748 }
 0x459   :  { %v1741_v31 = vunpack.i.h.bf16 %v1739_v28  ;;  %v1740_v32 = vunpack.i.l.bf16 %v1739_v28  ;;  %v559_v35 = vsel %vm522_vm9, %v558_v26, %v1715_v24  ;;  %v523_v36 = vsel %vm522_vm9, %v521_v27, %v1720_v25 }
 0x45a   :  { %v1750_v38 = vunpack.i.l.bf16 %v1749_v29  ;;  %v560_v39 = vsel %vm524_vm10, %v559_v35, %v1716_v30  ;;  %v525_v40 = vsel %vm524_vm10, %v523_v36, %v1721_v8  ;;  %v1751_v42 = vunpack.i.h.bf16 %v1749_v29 }
 0x45b   :  { %v688_v37 = vsel %vm514_vm6, %v687_v33, %v1740_v32  ;;  %v561_v45 = vpack.c.bf16 %v560_v39, %v560_v39  ;;  %v526_v46 = vpack.c.bf16 %v525_v40, %v525_v40 }
 0x45c   :  { %v689_v41 = vsel %vm516_vm7, %v688_v37, %v1741_v31  ;;  %v749_v43 = vpop.permute.xlu1 %748  ;;  %v1754_v44 = vpop.permute.xlu0 %1753 }
 0x45d   :  { %v690_v47 = vsel %vm518_vm4, %v689_v41, %v1750_v38  ;;  %v760_v48 = vsel %vm516_vm7, %v759_v34, %v749_v43  ;;  %v1756_v49 = vunpack.i.h.bf16 %v1754_v44  ;;  %v1755_v50 = vunpack.i.l.bf16 %v1754_v44  ;;  %563 = vrot.lane.b32.xlu1 %v561_v45, %s1867_s11  ;;  %612 = vrot.lane.b32.xlu0 %v526_v46, %s1867_s11 }
 0x45e   :  { %v691_v51 = vsel %vm520_vm8, %v690_v47, %v1751_v42  ;;  %v761_v56 = vsel %vm518_vm4, %v760_v48, %v1746_v16 }
 0x45f   :  { %v692_v54 = vsel %vm522_vm9, %v691_v51, %v1755_v50 }
 0x460   :  { %v753_v55 = vpop.permute.xlu1 %752  ;;  %v693_v57 = vsel %vm524_vm10, %v692_v54, %v1756_v49  ;;  %v756_v60 = vpop.permute.xlu0 %755 }
 0x461   :  { %v762_v58 = vsel %vm520_vm8, %v761_v56, %v753_v55  ;;  %v694_v59 = vpack.c.bf16 %v693_v57, %v693_v57 }
 0x462   :  { %v763_v61 = vsel %vm522_vm9, %v762_v58, %v1721_v8 }
 0x463   :  { %v764_v62 = vsel %vm524_vm10, %v763_v61, %v756_v60  ;;  %696 = vrot.lane.b32.xlu1 %v694_v59, %s1867_s11 }
 0x464   :  { %v765_v63 = vpack.c.bf16 %v764_v62, %v764_v62 }
 0x466   :  { %767 = vrot.lane.b32.xlu0 %v765_v63, %s1867_s11 }
 0x467   :  { %832 = vrot.lane.b32.xlu1 %v1933_v11, %s1861_s27 }
 0x46a   :  { %925 = vrot.lane.b32.xlu0 %v1933_v11, %s1863_s2 }
 0x46b   :  { %1018 = vrot.lane.b32.xlu1 %v1933_v11, %s1862_s28 }
 0x46e   :  { %923 = vrot.lane.b32.xlu0 %v1933_v11, %s1860_s0 }
 0x46f   :  { %1111 = vrot.lane.b32.xlu1 %v1933_v11, %s1865_s30 }
 0x472   :  { %1016 = vrot.lane.b32.xlu0 %v1933_v11, %s1864_s29 }
 0x473   :  { %1109 = vrot.lane.b32.xlu1 %v1933_v11, %s1866_s6 }
 0x4cf   :  { %v564_v5 = vpop.permute.xlu1 %563  ;;  %v613_v6 = vpop.permute.xlu0 %612 }
 0x4d0   :  { %1634 = vmatmul.mubr.msk.bf16.vlgmr.msra.gmra.mxu1 %vm109_vm2, %v564_v5  ;;  %1640 = vmatmul.mubr.msk.bf16.vlgmr.msra.gmra.mxu0 %vm109_vm2, %v613_v6 }
 0x4d1   :  { %1644 = vmatpush3.bf16.msra.mxu1 %v2065_v3  ;;  %1650 = vmatpush3.bf16.msra.mxu0 %v2068_v4 }
 0x4d2   :  { %1645 = vmatprep.mubr.msk.bf16.mxu1 %vm1859_vm0, %v1858_v1  ;;  %1651 = vmatprep.mubr.msk.bf16.mxu0 %vm1859_vm0, %v1858_v1 }
 0x4d3   :  { %1655 = vmatprep.subr.mxu1 %v1858_v1  ;;  %1660 = vmatprep.subr.mxu0 %v1858_v1 }
 0x4d5   :  { %v697_v7 = vpop.permute.xlu1 %696 }
 0x4d8   :  { %v768_v9 = vpop.permute.xlu0 %767  ;;  %1646 = vmatmul.mubr.msk.bf16.vlgmr.msra.gmra.mxu1 %vm109_vm2, %v697_v7 }
 0x4d9   :  { %v833_v10 = vpop.permute.xlu1 %832  ;;  %1652 = vmatmul.mubr.msk.bf16.vlgmr.msra.gmra.mxu0 %vm109_vm2, %v768_v9  ;;  %1657 = vmatprep.mubr.msk.f32.mxu1 %vm1859_vm0, %v1858_v1 }
 0x4da   :  { %1656 = vmatpush3.xpose.msk.msra.mxu1 %vm109_vm2, %v833_v10  ;;  %1662 = vmatprep.mubr.msk.f32.mxu0 %vm1859_vm0, %v1858_v1 }
 0x4db   :  { %1665 = vmatprep.subr.mxu1 %v1858_v1 }
 0x4dc   :  { %v926_v12 = vpop.permute.xlu0 %925 }
 0x4dd   :  { %v1019_v13 = vpop.permute.xlu1 %1018  ;;  %1661 = vmatpush3.xpose.msk.msra.mxu0 %vm109_vm2, %v926_v12 }
 0x4de   :  { %1670 = vmatprep.subr.mxu0 %v1858_v1 }
 0x4e0   :  { %v924_v14 = vpop.permute.xlu0 %923  ;;  %1658 = vmatmul.mubr.msk.f32.vlgmr.msra.gmra.mxu1 %vm109_vm2, %v1933_v11 }
 0x4e1   :  { %v1112_v15 = vpop.permute.xlu1 %1111  ;;  %1663 = vmatmul.mubr.msk.f32.vlgmr.msra.gmra.mxu0 %vm109_vm2, %v924_v14  ;;  %1666 = vmatpush3.xpose.msk.msra.mxu1 %vm109_vm2, %v1019_v13 }
 0x4e2   :  { %1671 = vmatpush3.xpose.msk.msra.mxu0 %vm109_vm2, %v1112_v15  ;;  %1667 = vmatprep.mubr.msk.f32.mxu1 %vm1859_vm0, %v1858_v1 }
 0x4e3   :  { %1672 = vmatprep.mubr.msk.f32.mxu0 %vm1859_vm0, %v1858_v1  ;;  %1675 = vmatprep.subr.bf16.mxu1 %v1858_v1 }
 0x4e4   :  { %v1017_v16 = vpop.permute.xlu0 %1016  ;;  %1681 = vmatprep.subr.bf16.mxu0 %v1858_v1 }
 0x4e5   :  { %v1110_v17 = vpop.permute.xlu1 %1109  ;;  %1668 = vmatmul.mubr.msk.f32.vlgmr.msra.gmra.mxu1 %vm109_vm2, %v1017_v16 }
 0x4e6   :  { %1673 = vmatmul.mubr.msk.f32.vlgmr.msra.gmra.mxu0 %vm109_vm2, %v1110_v17  ;;  %1676 = vmatpush3.bf16.msra.mxu1 %v1999_v52 }
 0x4e7   :  { %1677 = vmatprep.mubr.msk.bf16.mxu1 %vm1859_vm0, %v1858_v1  ;;  %1682 = vmatpush3.bf16.msra.mxu0 %v2002_v53  ;;  %v2114_v53 = vld [vmem:[%s2195_s4] ss:$0 sm:$0xff]  ;;  %s1868_s4 = smov [#allocation2]  }
 0x4e8   :  { %1683 = vmatprep.mubr.msk.bf16.mxu0 %vm1859_vm0, %v1858_v1  ;;  %1687 = vmatprep.subr.bf16.mxu1 %v1858_v1  ;;  %s1528_s17 = sshll.u32 %s1868_s4, 4  ;;  %s1529_s17 = int_to_ptr.vmem [resolvable:$true] %s1528_s17 }
 0x4e9   :  { %1693 = vmatprep.subr.bf16.mxu0 %v1858_v1  ;;  %s1836_s18 = scalar_lea.vmem %s1529_s17, 256  ;;  %p1841_p1 = scmp.lt.s32.totalorder %s1529_s17, %s1529_s17 }
 0x4ea   :  { %p1837_p0 = scmp.ne.s32.totalorder %s1529_s17, %s1836_s18  ;;  %p1842_p2 = scmp.lt.s32.totalorder %s1836_s18, %s1836_s18 }
 0x4ec   :  { %p1843_p3 = por %p1842_p2, %p1841_p1 }
 0x4ee   :  { %p1844_p4 = pnand %p1843_p3, %p1837_p0 }
 0x590   :  { %v605_v18 = vpop.f32.mrf.mxu1  ;;  %v654_v19 = vpop.f32.mrf.mxu0 }
 0x591   :  { %v655_v25 = vadd.f32 %v654_v19, %v605_v18 }
 0x592   :  { %v1635_v20 = vpop.f32.mrf.mxu1  ;;  %v1641_v21 = vpop.f32.mrf.mxu0 }
 0x594   :  { %v608_v22 = vpop.f32.mrf.mxu1  ;;  %v657_v23 = vpop.f32.mrf.mxu0 }
 0x596   :  { %v1636_v24 = vpop.f32.mrf.mxu1  ;;  %v1642_v52 = vpop.f32.mrf.mxu0 }
 0x598   :  { %v738_v26 = vpop.f32.mrf.mxu1 }
 0x599   :  { %v809_v27 = vpop.f32.mrf.mxu0  ;;  %v744_v28 = vadd.f32 %v738_v26, %v655_v25 }
 0x59a   :  { %v1647_v29 = vpop.f32.mrf.mxu1 }
 0x59b   :  { %v1653_v30 = vpop.f32.mrf.mxu0  ;;  %v815_v8 = vadd.f32 %v809_v27, %v744_v28 }
 0x59c   :  { %v741_v31 = vpop.f32.mrf.mxu1  ;;  %v824_v30 = vsel %vm98_vm3, %v1933_v11, 0.0 }
 0x59d   :  { %v812_v32 = vpop.f32.mrf.mxu0  ;;  %v822_v33 = vadd.f32 %v2114_v53, %v815_v8  ;;  %v825_v8 = vrot.slane %v824_v30, 4 }
 0x59e   :  { %v1648_v34 = vpop.f32.mrf.mxu1 }
 0x59f   :  { %v1654_v35 = vpop.f32.mrf.mxu0  ;;  %823 = vst.msk [vmem:[#allocation2] sm:$0xff] %vm48_vm1, %v822_v33  ;;  %v826_v31 = vadd.f32 %v825_v8, %v824_v30 }
 0x5a0   :  { %v904_v36 = vpop.f32.mrf.mxu1 }
 0x5a1   :  { %v997_v37 = vpop.f32.mrf.mxu0  ;;  %v908_v49 = vmul.f32 0.35355338, %v904_v36  ;;  %v827_v32 = vrot.slane %v826_v31, 2 }
 0x5a2   :  { %v1001_v38 = vmul.f32 0.35355338, %v997_v37  ;;  %v1659_v39 = vpop.f32.mrf.mxu1 }
 0x5a3   :  { %v1664_v40 = vpop.f32.mrf.mxu0  ;;  %v909_v51 = vsel %vm109_vm2, %v908_v49, -inf  ;;  %v828_v33 = vadd.f32 %v827_v32, %v826_v31 }
 0x5a4   :  { %v1002_v41 = vsel %vm109_vm2, %v1001_v38, -inf }
 0x5a5   :  { %v1090_v42 = vpop.f32.mrf.mxu1  ;;  %1003 = vmax.xlane.f32.xlu0 %v1002_v41  ;;  %v829_v34 = vrot.slane %v828_v33, 1 }
 0x5a6   :  { %v1094_v43 = vmul.f32 0.35355338, %v1090_v42  ;;  %v1183_v44 = vpop.f32.mrf.mxu0 }
 0x5a7   :  { %v1187_v45 = vmul.f32 0.35355338, %v1183_v44  ;;  %v1669_v46 = vpop.f32.mrf.mxu1  ;;  %v830_v35 = vadd.f32 %v829_v34, %v828_v33 }
 0x5a8   :  { %v1674_v47 = vpop.f32.mrf.mxu0  ;;  %v1095_v48 = vsel %vm109_vm2, %v1094_v43, -inf }
 0x5a9   :  { %1096 = vmax.xlane.f32.xlu1 %v1095_v48  ;;  %v1188_v50 = vsel %vm109_vm2, %v1187_v45, -inf }
 0x5aa   :  { %1189 = vmax.xlane.f32.xlu0 %v1188_v50 }
 0x5ae   :  { %910 = vmax.xlane.f32.xlu0 %v909_v51 }
 0x62e   :  { %v1004_v54 = vpop.xlane.xlu0 %1003 }
 0x62f   :  { %v1005_v55 = vsub.f32 %v1001_v38, %v1004_v54 }
 0x631   :  { %v1006_v56 = vmul.f32 1.442695, %v1005_v55 }
 0x632   :  { %v1097_v57 = vpop.xlane.xlu1 %1096 }
 0x633   :  { %1820 = vpow2.f32 %v1006_v56  ;;  %v1098_v58 = vsub.f32 %v1094_v43, %v1097_v57  ;;  %v1190_v59 = vpop.xlane.xlu0 %1189 }
 0x634   :  { %v1191_v60 = vsub.f32 %v1187_v45, %v1190_v59 }
 0x635   :  { %v1099_v61 = vmul.f32 1.442695, %v1098_v58 }
 0x636   :  { %v1192_v62 = vmul.f32 1.442695, %v1191_v60 }
 0x637   :  { %1822 = vpow2.f32 %v1099_v61  ;;  %v911_v63 = vpop.xlane.xlu0 %910 }
 0x638   :  { %1824 = vpow2.f32 %v1192_v62  ;;  %v912_v0 = vsub.f32 %v908_v49, %v911_v63 }
 0x63a   :  { %v913_v2 = vmul.f32 1.442695, %v912_v0 }
 0x63c   :  { %1826 = vpow2.f32 %v913_v2 }
 0x640   :  { %v1821_v5 = vpop.eup %1820 }
 0x641   :  { %v1008_v6 = vsel %vm109_vm2, %v1821_v5, 0.0 }
 0x642   :  { %1009 = vadd.xlane.f32.xlu1 %v1008_v6 }
 0x644   :  { %v1823_v7 = vpop.eup %1822 }
 0x645   :  { %v1825_v9 = vpop.eup %1824  ;;  %v1101_v10 = vsel %vm109_vm2, %v1823_v7, 0.0 }
 0x646   :  { %1102 = vadd.xlane.f32.xlu0 %v1101_v10  ;;  %v1194_v12 = vsel %vm109_vm2, %v1825_v9, 0.0 }
 0x647   :  { %1195 = vadd.xlane.f32.xlu1 %v1194_v12 }
 0x649   :  { %v1827_v13 = vpop.eup %1826 }
 0x64a   :  { %v915_v14 = vsel %vm109_vm2, %v1827_v13, 0.0 }
 0x64b   :  { %916 = vadd.xlane.f32.xlu0 %v915_v14 }
 0x6cb   :  { %v1010_v15 = vpop.xlane.xlu1 %1009 }
 0x6cc   :  { %1828 = vrcp.f32 %v1010_v15 }
 0x6cf   :  { %v1103_v16 = vpop.xlane.xlu0 %1102 }
 0x6d0   :  { %1830 = vrcp.f32 %v1103_v16  ;;  %v1196_v17 = vpop.xlane.xlu1 %1195 }
 0x6d1   :  { %1832 = vrcp.f32 %v1196_v17 }
 0x6d4   :  { %v917_v18 = vpop.xlane.xlu0 %916 }
 0x6d5   :  { %1834 = vrcp.f32 %v917_v18 }
 0x6d9   :  { %v1829_v19 = vpop.eup %1828 }
 0x6da   :  { %v1012_v20 = vmul.f32 %v1829_v19, %v1821_v5 }
 0x6dc   :  { %v1013_v21 = vsel %vm109_vm2, %v1012_v20, 0.0 }
 0x6dd   :  { %v1831_v22 = vpop.eup %1830  ;;  %1014 = vadd.xlane.f32.xlu1 %v1013_v21 }
 0x6de   :  { %v1833_v23 = vpop.eup %1832  ;;  %v1105_v24 = vmul.f32 %v1831_v22, %v1823_v7 }
 0x6df   :  { %v1198_v52 = vmul.f32 %v1833_v23, %v1825_v9 }
 0x6e0   :  { %v1106_v25 = vsel %vm109_vm2, %v1105_v24, 0.0 }
 0x6e1   :  { %1107 = vadd.xlane.f32.xlu0 %v1106_v25  ;;  %v1199_v26 = vsel %vm109_vm2, %v1198_v52, 0.0 }
 0x6e2   :  { %v1835_v27 = vpop.eup %1834  ;;  %1200 = vadd.xlane.f32.xlu1 %v1199_v26 }
 0x6e3   :  { %v919_v28 = vmul.f32 %v1835_v27, %v1827_v13 }
 0x6e5   :  { %v920_v29 = vsel %vm109_vm2, %v919_v28, 0.0 }
 0x6e6   :  { %921 = vadd.xlane.f32.xlu0 %v920_v29 }
 0x766   :  { %v1015_v36 = vpop.xlane.xlu1 %1014 }
 0x767   :  { %v1203_v37 = vmul.f32 %v1015_v36, %v830_v35 }
 0x769   :  { %v1248_v38 = vrot.slane %v1203_v37, 7  ;;  %v1252_v39 = vrot.slane %v1203_v37, 2  ;;  %v1210_v40 = vrot.slane %v1203_v37, 6  ;;  %v1214_v41 = vrot.slane %v1203_v37, 1 }
 0x76a   :  { %v1108_v42 = vpop.xlane.xlu0 %1107  ;;  %v1378_v56 = vrot.slane %v1203_v37, 3  ;;  %v1455_v0 = vrot.slane %v1203_v37, 4 }
 0x76b   :  { %v1204_v43 = vmul.f32 %v1108_v42, %v830_v35  ;;  %v1201_v44 = vpop.xlane.xlu1 %1200  ;;  %v1757_v45 = vpack.i.bf16 %v1252_v39, %v1248_v38  ;;  %v1762_v46 = vpack.i.bf16 %v1214_v41, %v1210_v40 }
 0x76c   :  { %v1205_v47 = vmul.f32 %v1201_v44, %v830_v35  ;;  %v1782_v60 = vpack.i.bf16 %v1378_v56, %v1203_v37 }
 0x76d   :  { %1758 = vrot.lane.b32.xlu1 %v1757_v45, %s1860_s0  ;;  %1763 = vrot.lane.b32.xlu0 %v1762_v46, %s1860_s0  ;;  %v1256_v11 = vrot.slane %v1204_v43, 5  ;;  %v1219_v51 = vrot.slane %v1204_v43, 4  ;;  %v1223_v54 = vrot.slane %v1204_v43, 7  ;;  %v1382_v62 = vrot.slane %v1204_v43, 6 }
 0x76e   :  { %v1263_v48 = vrot.slane %v1205_v47, 3  ;;  %v1267_v49 = vrot.slane %v1205_v47, 6  ;;  %v1228_v58 = vrot.slane %v1205_v47, 2  ;;  %v1232_v59 = vrot.slane %v1205_v47, 5 }
 0x76f   :  { %v1767_v50 = vpack.i.bf16 %v1204_v43, %v1256_v11  ;;  %v1772_v57 = vpack.i.bf16 %v1223_v54, %v1219_v51  ;;  %v1386_v63 = vrot.slane %v1204_v43, 1  ;;  %v1390_v5 = vrot.slane %v1205_v47, 4  ;;  %v922_v10 = vpop.xlane.xlu0 %921 }
 0x770   :  { %v1777_v55 = vpack.i.bf16 %v1267_v49, %v1263_v48  ;;  %v1787_v61 = vpack.i.bf16 %v1232_v59, %v1228_v58  ;;  %v1394_v6 = vrot.slane %v1205_v47, 7  ;;  %v1459_v7 = vrot.slane %v1204_v43, 2 }
 0x771   :  { %1768 = vrot.lane.b32.xlu1 %v1767_v50, %s1864_s29  ;;  %v1792_v2 = vpack.i.bf16 %v1386_v63, %v1382_v62  ;;  %v1202_v12 = vmul.f32 %v922_v10, %v830_v35 }
 0x772   :  { %1778 = vrot.lane.b32.xlu0 %v1777_v55, %s1866_s6  ;;  %v1797_v9 = vpack.i.bf16 %v1394_v6, %v1390_v5 }
 0x773   :  { %v1244_v13 = vrot.slane %v1202_v12, 1  ;;  %v1246_v14 = vrot.slane %v1202_v12, 4  ;;  %v1207_v20 = vrot.slane %v1202_v12, 3  ;;  %v1371_v36 = vrot.slane %v1202_v12, 2 }
 0x774   :  { %v1373_v40 = vrot.slane %v1202_v12, 5  ;;  %v1453_v44 = vrot.slane %v1202_v12, 6 }
 0x775   :  { %1773 = vrot.lane.b32.xlu1 %v1772_v57, %s1864_s29  ;;  %v1271_v19 = vsel %vm512_vm5, %v1244_v13, %v1246_v14  ;;  %v1236_v27 = vsel %vm512_vm5, %v1202_v12, %v1207_v20 }
 0x776   :  { %1783 = vrot.lane.b32.xlu0 %v1782_v60, %s1860_s0  ;;  %v1398_v50 = vsel %vm512_vm5, %v1371_v36, %v1373_v40  ;;  %v1466_v56 = vsel %vm512_vm5, %v1207_v20, %v1453_v44 }
 0x779   :  { %1788 = vrot.lane.b32.xlu1 %v1787_v61, %s1866_s6 }
 0x77a   :  { %1456 = vrot.lane.b32.xlu0 %v1455_v0, %s1860_s0 }
 0x77d   :  { %1793 = vrot.lane.b32.xlu1 %v1792_v2, %s1864_s29 }
 0x77e   :  { %1460 = vrot.lane.b32.xlu0 %v1459_v7, %s1864_s29 }
 0x781   :  { %1798 = vrot.lane.b32.xlu1 %v1797_v9, %s1866_s6 }
 0x785   :  { %1463 = vrot.lane.b32.xlu1 %v1205_v47, %s1866_s6 }
 0x7df   :  { %v1759_v15 = vpop.permute.xlu1 %1758  ;;  %v1764_v16 = vpop.permute.xlu0 %1763 }
 0x7e0   :  { %v1760_v17 = vunpack.i.l.bf16 %v1759_v15  ;;  %v1761_v18 = vunpack.i.h.bf16 %v1759_v15  ;;  %v1765_v22 = vunpack.i.l.bf16 %v1764_v16  ;;  %v1766_v28 = vunpack.i.h.bf16 %v1764_v16 }
 0x7e2   :  { %v1272_v21 = vsel %vm514_vm6, %v1271_v19, %v1760_v17  ;;  %v1237_v30 = vsel %vm514_vm6, %v1236_v27, %v1765_v22  ;;  %v1467_v57 = vsel %vm514_vm6, %v1466_v56, %v1766_v28 }
 0x7e3   :  { %v1769_v23 = vpop.permute.xlu1 %1768  ;;  %v1273_v26 = vsel %vm516_vm7, %v1272_v21, %v1761_v18  ;;  %v1238_v38 = vsel %vm516_vm7, %v1237_v30, %v1766_v28 }
 0x7e4   :  { %v1771_v24 = vunpack.i.h.bf16 %v1769_v23  ;;  %v1770_v52 = vunpack.i.l.bf16 %v1769_v23  ;;  %v1779_v25 = vpop.permute.xlu0 %1778 }
 0x7e5   :  { %v1780_v29 = vunpack.i.l.bf16 %v1779_v25  ;;  %v1781_v32 = vunpack.i.h.bf16 %v1779_v25 }
 0x7e6   :  { %v1274_v8 = vsel %vm518_vm4, %v1273_v26, %v1770_v52 }
 0x7e7   :  { %v1275_v31 = vsel %vm520_vm8, %v1274_v8, %v1771_v24  ;;  %v1774_v33 = vpop.permute.xlu1 %1773 }
 0x7e8   :  { %v1276_v34 = vsel %vm522_vm9, %v1275_v31, %v1780_v29  ;;  %v1775_v35 = vunpack.i.l.bf16 %v1774_v33  ;;  %v1784_v37 = vpop.permute.xlu0 %1783  ;;  %v1776_v39 = vunpack.i.h.bf16 %v1774_v33 }
 0x7e9   :  { %v1277_v41 = vsel %vm524_vm10, %v1276_v34, %v1781_v32  ;;  %v1785_v43 = vunpack.i.l.bf16 %v1784_v37  ;;  %v1786_v51 = vunpack.i.h.bf16 %v1784_v37 }
 0x7ea   :  { %v1239_v42 = vsel %vm518_vm4, %v1238_v38, %v1775_v35  ;;  %v1278_v45 = vpack.c.bf16 %v1277_v41, %v1277_v41 }
 0x7eb   :  { %v1789_v46 = vpop.permute.xlu1 %1788  ;;  %v1240_v49 = vsel %vm520_vm8, %v1239_v42, %v1776_v39  ;;  %v1399_v54 = vsel %vm514_vm6, %v1398_v50, %v1785_v43 }
 0x7ec   :  { %v1791_v47 = vunpack.i.h.bf16 %v1789_v46  ;;  %v1790_v11 = vunpack.i.l.bf16 %v1789_v46  ;;  %v1457_v48 = vpop.permute.xlu0 %1456  ;;  %1280 = vrot.lane.b32.xlu0 %v1278_v45, %s1867_s11  ;;  %v1400_v63 = vsel %vm516_vm7, %v1399_v54, %v1786_v51 }
 0x7ed   :  { %v1468_v60 = vsel %vm516_vm7, %v1467_v57, %v1457_v48 }
 0x7ee   :  { %v1241_v55 = vsel %vm522_vm9, %v1240_v49, %v1790_v11  ;;  %v1469_v6 = vsel %vm518_vm4, %v1468_v60, %v1776_v39 }
 0x7ef   :  { %v1794_v58 = vpop.permute.xlu1 %1793  ;;  %v1242_v59 = vsel %vm524_vm10, %v1241_v55, %v1791_v47 }
 0x7f0   :  { %v1795_v61 = vunpack.i.l.bf16 %v1794_v58  ;;  %v1243_v62 = vpack.c.bf16 %v1242_v59, %v1242_v59  ;;  %v1796_v0 = vunpack.i.h.bf16 %v1794_v58  ;;  %v1461_v2 = vpop.permute.xlu0 %1460 }
 0x7f1   :  { %v1470_v9 = vsel %vm520_vm8, %v1469_v6, %v1461_v2 }
 0x7f2   :  { %v1401_v5 = vsel %vm518_vm4, %v1400_v63, %v1795_v61  ;;  %1326 = vrot.lane.b32.xlu1 %v1243_v62, %s1867_s11  ;;  %v1471_v16 = vsel %vm522_vm9, %v1470_v9, %v1791_v47 }
 0x7f3   :  { %v1799_v7 = vpop.permute.xlu1 %1798  ;;  %v1402_v13 = vsel %vm520_vm8, %v1401_v5, %v1796_v0 }
 0x7f4   :  { %v1801_v10 = vunpack.i.h.bf16 %v1799_v7  ;;  %v1800_v12 = vunpack.i.l.bf16 %v1799_v7 }
 0x7f6   :  { %v1403_v14 = vsel %vm522_vm9, %v1402_v13, %v1800_v12 }
 0x7f7   :  { %v1464_v15 = vpop.permute.xlu1 %1463  ;;  %v1404_v17 = vsel %vm524_vm10, %v1403_v14, %v1801_v10 }
 0x7f8   :  { %v1472_v18 = vsel %vm524_vm10, %v1471_v16, %v1464_v15  ;;  %v1405_v19 = vpack.c.bf16 %v1404_v17, %v1404_v17 }
 0x7f9   :  { %v1473_v20 = vpack.c.bf16 %v1472_v18, %v1472_v18 }
 0x7fa   :  { %1407 = vrot.lane.b32.xlu0 %v1405_v19, %s1867_s11 }
 0x7fb   :  { %1475 = vrot.lane.b32.xlu1 %v1473_v20, %s1867_s11 }
 0x85e   :  { %v1281_v21 = vpop.permute.xlu0 %1280 }
 0x85f   :  { %1678 = vmatmul.mubr.msk.bf16.vlgmr.msra.gmra.mxu1 %vm109_vm2, %v1281_v21 }
 0x860   :  { %1688 = vmatpush3.bf16.msra.mxu1 %v2065_v3  ;;  %1689 = vmatprep.mubr.msk.bf16.mxu1 %vm1859_vm0, %v1858_v1 }
 0x864   :  { %v1327_v22 = vpop.permute.xlu1 %1326 }
 0x865   :  { %1684 = vmatmul.mubr.msk.bf16.vlgmr.msra.gmra.mxu0 %vm109_vm2, %v1327_v22 }
 0x866   :  { %1694 = vmatpush3.bf16.msra.mxu0 %v2068_v4  ;;  %1695 = vmatprep.mubr.msk.bf16.mxu0 %vm1859_vm0, %v1858_v1 }
 0x86c   :  { %v1408_v23 = vpop.permute.xlu0 %1407 }
 0x86d   :  { %1690 = vmatmul.mubr.msk.bf16.vlgmr.msra.gmra.mxu1 %vm109_vm2, %v1408_v23  ;;  %v1476_v24 = vpop.permute.xlu1 %1475 }
 0x86e   :  { %1696 = vmatmul.mubr.msk.bf16.vlgmr.msra.gmra.mxu0 %vm109_vm2, %v1476_v24 }
 0x91f   :  { %v1319_v52 = vpop.f32.mrf.mxu1 }
 0x921   :  { %v1679_v25 = vpop.f32.mrf.mxu1 }
 0x923   :  { %v1322_v3 = vpop.f32.mrf.mxu1 }
 0x925   :  { %v1680_v26 = vpop.f32.mrf.mxu1  ;;  %v1365_v27 = vpop.f32.mrf.mxu0 }
 0x926   :  { %v1366_v8 = vadd.f32 %v1365_v27, %v1319_v52 }
 0x927   :  { %v1685_v28 = vpop.f32.mrf.mxu0 }
 0x929   :  { %v1368_v29 = vpop.f32.mrf.mxu0 }
 0x92b   :  { %v1686_v30 = vpop.f32.mrf.mxu0 }
 0x92d   :  { %v1446_v31 = vpop.f32.mrf.mxu1 }
 0x92e   :  { %v1452_v4 = vadd.f32 %v1446_v31, %v1366_v8  ;;  %v1514_v32 = vpop.f32.mrf.mxu0 }
 0x92f   :  { %v1691_v33 = vpop.f32.mrf.mxu1 }
 0x930   :  { %v1520_v1 = vadd.f32 %v1514_v32, %v1452_v4  ;;  %v1697_v34 = vpop.f32.mrf.mxu0 }
 0x931   :  { %v1449_v35 = vpop.f32.mrf.mxu1 }
 0x932   :  { %v1521_v36 = vadd.f32 %v2114_v53, %v1520_v1  ;;  %v1517_v37 = vpop.f32.mrf.mxu0 }
 0x933   :  { %v1692_v38 = vpop.f32.mrf.mxu1 }
 0x934   :  { %1522 = vst.msk [vmem:[#allocation2 + $0x8] sm:$0xff] %vm48_vm1, %v1521_v36  ;;  %v1698_v39 = vpop.f32.mrf.mxu0 }
 0x935   :  { %1847 = shalt.err (!%p1844_p4)
}
 0x936   :  { %s1869_s19 = smov 128   ;;  %s1870_s20 = smov 8  }
 0x937   :  { %1534 = dma.vmem_to_hbm [thread:$0]  %s1529_s17, 256, %s2196_s5, [#allocation3], %s1869_s19, %s1869_s19, %s1870_s20  }
 0x938   :  { %1856 = dma.done.wait [#allocation3], 256  }
 0x939   :  { %1857 = vsyncadd [#allocation3], 4294967040 }
 0x93a   :  { %1538 = vsyncpa [#allocation3], 1 }

</bundles_post_ra>
